<compile_context>
chip_gen: v7x
topology: tpu7x:2x2x1
jax: 0.10.0
libtpu: 0.0.40
codegen_flags: <defaults>
</compile_context>

<pallas_src>
import functools

import numpy as np
import jax
import jax.numpy as jnp
from jax.experimental import pallas as pl
from jax.experimental.pallas import tpu as pltpu

# ------------------------- model hyper-parameters ---------------------------
BATCH = 4
SUBGRAPH_SIZE = 8          # S (nodes per subgraph)
N_IN = 16
N_H = 32
HIDDEN = 128
NEGSAMP_ROUND = 1
NUM_NODE = 64
ALPHA = 0.3
READOUT = "avg"            # Model built with readout='avg'

assert SUBGRAPH_SIZE & (SUBGRAPH_SIZE - 1) == 0, "S must be a power of two"
_S_SHIFT = SUBGRAPH_SIZE.bit_length() - 1

_POOL_GROUP = ((BATCH + 7) // 8) * 8   # sublane-aligned stride between pooled groups

# ----------------------- packed-slab layout constants -----------------------
# weight slab (WTS_ROWS, 128), f32 -- all row-group starts 8-aligned
R_GCN_W   = 0                                   # (N_IN, N_H)
R_COMB_W  = 16                                  # (N_H, N_H)
R_BNET_W1 = 48                                  # (S+1, N_H//2)
R_BNET_W2 = 64                                  # (N_H//2, N_H)
R_NET_W2  = 80                                  # (HIDDEN, HIDDEN)
R_NET_W3  = 208                                 # (HIDDEN, N_IN)
R_POOL    = 336                                 # (3*_POOL_GROUP, 2*B*S)
R_BIAS    = 360                                 # 7 bias rows (one per row)
WTS_ROWS  = 368

# fused [net_w1 | bil_w] slab: (N_H, 256): cols 0:HIDDEN = net_w1, HIDDEN:HIDDEN+N_H = bil_w
W2_COLS = 256

# per-call data slab (2*B*S, 128)
C_SEQ = 0                                       # cols [0, N_IN): stacked [seq1; seq2]
C_ADJ = N_IN                                    # cols [N_IN, N_IN+S): adj strip (rows 0:BS)
C_B   = N_IN + SUBGRAPH_SIZE                    # cols [.., ..+S+1): B matrix (rows 0:BS)
DATA_COLS = 128

# single lane-dense output block (OUT_ROWS, 128)
OUT_LOGITS_ROW = BATCH                                    # rows [0,B): now
OUT_KL_ROW = BATCH + (1 + NEGSAMP_ROUND) * BATCH          # rows [B, B+(1+neg)*B): logits
OUT_ROWS = ((OUT_KL_ROW + 1 + 7) // 8) * 8


def _prelu(x, a):
    return jnp.where(x > 0, x, a * x)


# ----------------------------- fused kernel ---------------------------------
def _fused_forward_kernel(data_ref, wts_ref, w2_ref, scal_ref, out_ref):
    f32 = jnp.float32
    B, S, H = BATCH, SUBGRAPH_SIZE, N_H
    BS = B * S
    G = _POOL_GROUP

    # SMEM scalars: [gcn_a, comb_a, bnet_a1, bnet_a2, net_a1, net_a2, net_a3, bil_b]
    a_gcn, a_comb = scal_ref[0], scal_ref[1]
    a_b1, a_b2 = scal_ref[2], scal_ref[3]
    a_n1, a_n2, a_n3 = scal_ref[4], scal_ref[5], scal_ref[6]
    bil_b = scal_ref[7]

    # ---- static views into the packed weight slab (loads are tiny & local) ----
    gcn_w   = wts_ref[R_GCN_W:R_GCN_W + N_IN, 0:H]
    comb_w  = wts_ref[R_COMB_W:R_COMB_W + H, 0:H]
    bnet_w1 = wts_ref[R_BNET_W1:R_BNET_W1 + S + 1, 0:H // 2]
    bnet_w2 = wts_ref[R_BNET_W2:R_BNET_W2 + H // 2, 0:H]
    net_w2  = wts_ref[R_NET_W2:R_NET_W2 + HIDDEN, 0:HIDDEN]
    net_w3  = wts_ref[R_NET_W3:R_NET_W3 + HIDDEN, 0:N_IN]
    pool    = wts_ref[R_POOL:R_POOL + 3 * G, 0:2 * BS]
    gcn_b   = wts_ref[R_BIAS + 0:R_BIAS + 1, 0:H]
    comb_b  = wts_ref[R_BIAS + 1:R_BIAS + 2, 0:H]
    bnet_b1 = wts_ref[R_BIAS + 2:R_BIAS + 3, 0:H // 2]
    bnet_b2 = wts_ref[R_BIAS + 3:R_BIAS + 4, 0:H]
    net_b1  = wts_ref[R_BIAS + 4:R_BIAS + 5, 0:HIDDEN]
    net_b2  = wts_ref[R_BIAS + 5:R_BIAS + 6, 0:HIDDEN]
    net_b3  = wts_ref[R_BIAS + 6:R_BIAS + 7, 0:N_IN]

    # ---- unpack the per-call data slab ----
    seq      = data_ref[:, C_SEQ:C_SEQ + N_IN]       # (2BS, n_in)  [seq1; seq2]
    adj_flat = data_ref[0:BS, C_ADJ:C_ADJ + S]       # (BS, S)
    bmat     = data_ref[0:BS, C_B:C_B + S + 1]       # (BS, S+1)

    # ---- block-diagonal adjacency built in-register (torch.bmm -> one matmul) ----
    adj2 = jnp.concatenate([adj_flat, adj_flat], axis=0)            # (2BS, S)
    lane = jax.lax.broadcasted_iota(jnp.int32, (S, 2 * BS), 1)
    subl = jax.lax.broadcasted_iota(jnp.int32, (S, 2 * BS), 0)
    rep = (jnp.bitwise_and(lane, S - 1) == subl).astype(f32)        # rep[j,c] = [c%S == j]
    tiled = jnp.dot(adj2, rep, preferred_element_type=f32)          # tiled[r,c] = adj2[r, c%S]
    r_id = jax.lax.broadcasted_iota(jnp.int32, (2 * BS, 2 * BS), 0)
    c_id = jax.lax.broadcasted_iota(jnp.int32, (2 * BS, 2 * BS), 1)
    blk = (jax.lax.shift_right_logical(r_id, _S_SHIFT)
           == jax.lax.shift_right_logical(c_id, _S_SHIFT)).astype(f32)
    bd_adj = tiled * blk                                            # (2BS, 2BS)

    # ---- GCN(n_in, n_h): prelu(adj @ (seq @ W) + b), shared by seq1|seq2 ----
    xw = jnp.dot(seq, gcn_w, preferred_element_type=f32)
    h = jnp.dot(bd_adj, xw, preferred_element_type=f32) + gcn_b
    h = _prelu(h, a_gcn)                                            # (2BS, n_h)

    # ---- B_network: (Linear + PReLU) x 2 ----
    b = _prelu(jnp.dot(bmat, bnet_w1, preferred_element_type=f32) + bnet_b1, a_b1)
    b1 = _prelu(jnp.dot(b, bnet_w2, preferred_element_type=f32) + bnet_b2, a_b2)
    b1_2 = jnp.concatenate([b1, b1], axis=0)                        # (2BS, n_h)

    # ---- combine_gcn on (h + alpha * b_1), still stacked ----
    xc = h + ALPHA * b1_2
    xw2 = jnp.dot(xc, comb_w, preferred_element_type=f32)
    h2 = _prelu(jnp.dot(bd_adj, xw2, preferred_element_type=f32) + comb_b, a_comb)

    h1f = h2[:BS]                      # h_1   (flattened (B*S, n_h))
    hrf = h2[BS:]                      # h_row

    # ---- KL: 0.5*(kl1+kl2); mean(sum(., dim=S)) == total_sum / (B*H) ----
    common = 1.0 + 2.0 * b1 - jnp.exp(2.0 * b1)
    inner = 2.0 * common - jnp.square(h1f) - jnp.square(hrf)
    tot = jnp.sum(jnp.sum(inner, axis=1, keepdims=True), axis=0, keepdims=True)
    kl = (-(0.25 / NUM_NODE) / (B * H)) * tot                        # (1, 1)

    # ---- all readouts in one pooling matmul, fused with recon layer-1 and
    #      the bilinear projection (shared K = n_h) ----
    pooled = jnp.dot(pool, h2, preferred_element_type=f32)           # (3G, n_h)
    proj = jnp.dot(pooled, w2_ref[...], preferred_element_type=f32)  # (3G, 256)
    c = pooled[0:B]                                                  # avg h_1[:, :-1, :]
    hw = proj[G:G + B, HIDDEN:HIDDEN + H]                            # h_mv @ bil_w
    y = _prelu(proj[2 * G:2 * G + B, 0:HIDDEN] + net_b1, a_n1)       # nei @ net_w1

    # ---- reconstruction MLP layers 2 & 3 ----
    y = _prelu(jnp.dot(y, net_w2, preferred_element_type=f32) + net_b2, a_n2)
    y = _prelu(jnp.dot(y, net_w3, preferred_element_type=f32) + net_b3, a_n3)

    # ---- Bilinear discriminator; negative shuffle by static sublane slicing ----
    scores = [jnp.sum(hw * c, axis=1, keepdims=True)]
    c_mi = c
    for _ in range(NEGSAMP_ROUND):
        c_mi = jnp.concatenate([c_mi[B - 2:B - 1], c_mi[:B - 1]], axis=0)
        scores.append(jnp.sum(hw * c_mi, axis=1, keepdims=True))
    logits = jnp.concatenate(scores, axis=0) + bil_b                 # ((1+neg)*B, 1)

    # ---- single lane-dense output block: [now | logits | kl] ----
    out_ref[...] = jnp.zeros_like(out_ref)
    out_ref[0:B, 0:N_IN] = y
    out_ref[OUT_LOGITS_ROW:OUT_LOGITS_ROW + (1 + NEGSAMP_ROUND) * B, 0:1] = logits
    out_ref[OUT_KL_ROW:OUT_KL_ROW + 1, 0:1] = kl


# ----------------------- static helper matrices ------------------------------
def _make_pool_matrix(B, S, group):
    """Pool @ h2(2BS,H) -> rows [c | h_mv | input_nei], groups padded to `group`."""
    BS = B * S
    P = np.zeros((3 * group, 2 * BS), np.float32)
    for b in range(B):
        # c = mean over h_1 nodes 0..S-2  (first half of the stack)
        P[b, b * S: b * S + S - 1] = 1.0 / (S - 1)
        # h_mv = h_1 last node
        P[group + b, b * S + S - 1] = 1.0
        # input_nei = mean over h_row nodes 0..S-3 (second half, offset BS)
        P[2 * group + b, BS + b * S: BS + b * S + S - 2] = 1.0 / (S - 2)
    return P


def _full_spec(shape):
    zeros = (0,) * len(shape)
    return pl.BlockSpec(shape, lambda zeros=zeros: zeros)


# ------------------------------ parameters ----------------------------------
def _xavier(key, fan_in, fan_out):
    bound = (6.0 / (fan_in + fan_out)) ** 0.5
    return jax.random.uniform(key, (fan_in, fan_out), jnp.float32, -bound, bound)


def init_params(key):
    ks = jax.random.split(key, 10)
    p025 = jnp.array([0.25], jnp.float32)
    return {
        "gcn_w": _xavier(ks[0], N_IN, N_H),
        "gcn_b": jnp.zeros((N_H,), jnp.float32),
        "gcn_a": p025,
        "comb_w": _xavier(ks[1], N_H, N_H),
        "comb_b": jnp.zeros((N_H,), jnp.float32),
        "comb_a": p025,
        "bnet_w1": _xavier(ks[2], SUBGRAPH_SIZE + 1, N_H // 2),
        "bnet_b1": jnp.zeros((N_H // 2,), jnp.float32),
        "bnet_a1": p025,
        "bnet_w2": _xavier(ks[3], N_H // 2, N_H),
        "bnet_b2": jnp.zeros((N_H,), jnp.float32),
        "bnet_a2": p025,
        "net_w1": _xavier(ks[4], N_H, HIDDEN),
        "net_b1": jnp.zeros((HIDDEN,), jnp.float32),
        "net_a1": p025,
        "net_w2": _xavier(ks[5], HIDDEN, HIDDEN),
        "net_b2": jnp.zeros((HIDDEN,), jnp.float32),
        "net_a2": p025,
        "net_w3": _xavier(ks[6], HIDDEN, N_IN),
        "net_b3": jnp.zeros((N_IN,), jnp.float32),
        "net_a3": p025,
        # Bilinear(n_h, n_h, 1): score = h_mv @ bil_w @ c^T + bil_b
        "bil_w": _xavier(ks[7], N_H, N_H),
        "bil_b": jnp.zeros((1,), jnp.float32),
    }


def pack_weights(params):
    """One-time packing of all weights/biases/constants into lane-dense slabs."""
    wts = np.zeros((WTS_ROWS, 128), np.float32)

    def put(r, a):
        a = np.asarray(a, np.float32)
        if a.ndim == 1:
            a = a[None, :]
        wts[r:r + a.shape[0], :a.shape[1]] = a

    put(R_GCN_W, params["gcn_w"])
    put(R_COMB_W, params["comb_w"])
    put(R_BNET_W1, params["bnet_w1"])
    put(R_BNET_W2, params["bnet_w2"])
    put(R_NET_W2, params["net_w2"])
    put(R_NET_W3, params["net_w3"])
    put(R_POOL, _make_pool_matrix(BATCH, SUBGRAPH_SIZE, _POOL_GROUP))
    put(R_BIAS + 0, params["gcn_b"])
    put(R_BIAS + 1, params["comb_b"])
    put(R_BIAS + 2, params["bnet_b1"])
    put(R_BIAS + 3, params["bnet_b2"])
    put(R_BIAS + 4, params["net_b1"])
    put(R_BIAS + 5, params["net_b2"])
    put(R_BIAS + 6, params["net_b3"])

    w2 = np.zeros((N_H, W2_COLS), np.float32)
    w2[:, :HIDDEN] = np.asarray(params["net_w1"], np.float32)
    w2[:, HIDDEN:HIDDEN + N_H] = np.asarray(params["bil_w"], np.float32)

    scal = np.concatenate([
        np.asarray(params["gcn_a"], np.float32),
        np.asarray(params["comb_a"], np.float32),
        np.asarray(params["bnet_a1"], np.float32),
        np.asarray(params["bnet_a2"], np.float32),
        np.asarray(params["net_a1"], np.float32),
        np.asarray(params["net_a2"], np.float32),
        np.asarray(params["net_a3"], np.float32),
        np.asarray(params["bil_b"], np.float32),
    ])
    return {"wts": jnp.asarray(wts), "w2": jnp.asarray(w2), "scal": jnp.asarray(scal)}


# ------------------------------- forward ------------------------------------
def forward(wts, w2, scal, seq1, adj, seq2, Bmat):
    B, S, Fin = seq1.shape
    BS = B * S

    # Single small prep fusion: pack seq1|seq2, adj strip and B into one
    # lane-dense (2BS, 128) slab.
    seq_flat = jnp.concatenate([seq1, seq2], axis=0).reshape(2 * BS, Fin)
    side = jnp.concatenate([adj.reshape(BS, S), Bmat.reshape(BS, S + 1)], axis=1)
    side = jnp.concatenate([side, jnp.zeros_like(side)], axis=0)          # (2BS, 2S+1)
    pad = jnp.zeros((2 * BS, DATA_COLS - Fin - (2 * S + 1)), jnp.float32)
    data = jnp.concatenate([seq_flat, side, pad], axis=1)                  # (2BS, 128)

    out = pl.pallas_call(
        _fused_forward_kernel,
        out_shape=jax.ShapeDtypeStruct((OUT_ROWS, 128), jnp.float32),
        in_specs=[
            _full_spec(data.shape),
            _full_spec(wts.shape),
            _full_spec(w2.shape),
            pl.BlockSpec(memory_space=pltpu.MemorySpace.SMEM),
        ],
        out_specs=pl.BlockSpec((OUT_ROWS, 128), lambda: (0, 0)),
    )(data, wts, w2, scal)

    now = out[0:B, 0:N_IN]
    n_logits = (1 + NEGSAMP_ROUND) * B
    logits = out[OUT_LOGITS_ROW:OUT_LOGITS_ROW + n_logits, 0:1]
    kl = out[OUT_KL_ROW, 0]
    return now, logits, kl


# -------------------------- pure-JAX reference -------------------------------
def _reference_forward(params, seq1, adj, seq2, Bmat):
    def gcn(x, a_, w, bias, alpha):
        xw = jnp.einsum("bsf,fh->bsh", x, w)
        out = jnp.einsum("bij,bjh->bih", a_, xw) + bias
        return _prelu(out, alpha[0])

    def lin(x, w, bias, alpha):
        return _prelu(x @ w + bias, alpha[0])

    h_1 = gcn(seq1, adj, params["gcn_w"], params["gcn_b"], params["gcn_a"])
    b = lin(Bmat, params["bnet_w1"], params["bnet_b1"], params["bnet_a1"])
    b_1 = lin(b, params["bnet_w2"], params["bnet_b2"], params["bnet_a2"])
    h_1 = gcn(h_1 + ALPHA * b_1, adj, params["comb_w"], params["comb_b"], params["comb_a"])
    h_row = gcn(seq2, adj, params["gcn_w"], params["gcn_b"], params["gcn_a"])
    h_row = gcn(h_row + ALPHA * b_1, adj, params["comb_w"], params["comb_b"], params["comb_a"])

    def kl(h):
        inner = 1.0 + 2.0 * b_1 - jnp.square(h) - jnp.square(jnp.exp(b_1))
        return -(0.5 / NUM_NODE * jnp.mean(jnp.sum(inner, axis=1)))

    kl_loss = 0.5 * (kl(h_row) + kl(h_1))

    S = h_row.shape[1]
    input_nei = jnp.mean(h_row[:, :S - 2, :], axis=1)
    now = lin(input_nei, params["net_w1"], params["net_b1"], params["net_a1"])
    now = lin(now, params["net_w2"], params["net_b2"], params["net_a2"])
    now = lin(now, params["net_w3"], params["net_b3"], params["net_a3"])

    c = jnp.mean(h_1[:, :-1, :], axis=1)
    h_mv = h_1[:, -1, :]
    hw = h_mv @ params["bil_w"]
    scs = [jnp.sum(hw * c, axis=1, keepdims=True)]
    c_mi = c
    for _ in range(NEGSAMP_ROUND):
        c_mi = jnp.concatenate([c_mi[-2:-1, :], c_mi[:-1, :]], axis=0)
        scs.append(jnp.sum(hw * c_mi, axis=1, keepdims=True))
    logits = jnp.concatenate(scs, axis=0) + params["bil_b"][0]
    return now, logits, kl_loss


# -------------------------------- main ---------------------------------------
if __name__ == "__main__":
    key = jax.random.PRNGKey(0)
    kp, k1, k2, k3, k4 = jax.random.split(key, 5)

    params = init_params(kp)
    packed = pack_weights(params)

    seq1 = jax.random.normal(k1, (BATCH, SUBGRAPH_SIZE, N_IN), jnp.float32)
    seq2 = jax.random.normal(k2, (BATCH, SUBGRAPH_SIZE, N_IN), jnp.float32)
    adj_raw = jax.random.uniform(k3, (BATCH, SUBGRAPH_SIZE, SUBGRAPH_SIZE), jnp.float32)
    adj = adj_raw / jnp.sum(adj_raw, axis=-1, keepdims=True)    # row-normalized
    Bmat = jax.random.normal(k4, (BATCH, SUBGRAPH_SIZE, SUBGRAPH_SIZE + 1), jnp.float32)

    fwd = jax.jit(functools.partial(forward, packed["wts"], packed["w2"], packed["scal"]))
    now, logits, kl_loss = fwd(seq1, adj, seq2, Bmat)
    jax.block_until_ready((now, logits, kl_loss))

    assert now.shape == (BATCH, N_IN)
    assert logits.shape == ((1 + NEGSAMP_ROUND) * BATCH, 1)
    assert kl_loss.shape == ()

    # correctness vs. pure-JAX reference of the PyTorch forward
    r_now, r_logits, r_kl = _reference_forward(params, seq1, adj, seq2, Bmat)
    np.testing.assert_allclose(np.asarray(now), np.asarray(r_now), rtol=1e-3, atol=1e-3)
    np.testing.assert_allclose(np.asarray(logits), np.asarray(r_logits), rtol=1e-3, atol=1e-3)
    np.testing.assert_allclose(np.asarray(kl_loss), np.asarray(r_kl), rtol=1e-3, atol=1e-3)

    print("KERNEL_OK")
</pallas_src>

<mosaic_0001>
module attributes {stable_mosaic.version = 11 : i64} {
  func.func @_fused_forward_kernel(%arg0: memref<64x128xf32, #tpu.memory_space<vmem>>, %arg1: memref<368x128xf32, #tpu.memory_space<vmem>>, %arg2: memref<32x256xf32, #tpu.memory_space<vmem>>, %arg3: memref<8xf32, #tpu.memory_space<smem>>, %arg4: memref<16x128xf32, #tpu.memory_space<vmem>>) attributes {dimension_semantics = [], scalar_prefetch = 0 : i64, scratch_operands = 0 : i64, tpu.core_type = #tpu.core_type<tc>} {
    %c0 = arith.constant 0 : index
    %0 = memref.load %arg3[%c0] : memref<8xf32, #tpu.memory_space<smem>>
    %c1 = arith.constant 1 : index
    %1 = memref.load %arg3[%c1] : memref<8xf32, #tpu.memory_space<smem>>
    %c2 = arith.constant 2 : index
    %2 = memref.load %arg3[%c2] : memref<8xf32, #tpu.memory_space<smem>>
    %c3 = arith.constant 3 : index
    %3 = memref.load %arg3[%c3] : memref<8xf32, #tpu.memory_space<smem>>
    %c4 = arith.constant 4 : index
    %4 = memref.load %arg3[%c4] : memref<8xf32, #tpu.memory_space<smem>>
    %c5 = arith.constant 5 : index
    %5 = memref.load %arg3[%c5] : memref<8xf32, #tpu.memory_space<smem>>
    %c6 = arith.constant 6 : index
    %6 = memref.load %arg3[%c6] : memref<8xf32, #tpu.memory_space<smem>>
    %c7 = arith.constant 7 : index
    %7 = memref.load %arg3[%c7] : memref<8xf32, #tpu.memory_space<smem>>
    %c0_0 = arith.constant 0 : index
    %c0_1 = arith.constant 0 : index
    %8 = vector.load %arg1[%c0_0, %c0_1] : memref<368x128xf32, #tpu.memory_space<vmem>>, vector<16x32xf32>
    %c16 = arith.constant 16 : index
    %c0_2 = arith.constant 0 : index
    %9 = vector.load %arg1[%c16, %c0_2] : memref<368x128xf32, #tpu.memory_space<vmem>>, vector<32x32xf32>
    %c48 = arith.constant 48 : index
    %c0_3 = arith.constant 0 : index
    %10 = vector.load %arg1[%c48, %c0_3] : memref<368x128xf32, #tpu.memory_space<vmem>>, vector<9x16xf32>
    %c64 = arith.constant 64 : index
    %c0_4 = arith.constant 0 : index
    %11 = vector.load %arg1[%c64, %c0_4] : memref<368x128xf32, #tpu.memory_space<vmem>>, vector<16x32xf32>
    %c80 = arith.constant 80 : index
    %c0_5 = arith.constant 0 : index
    %12 = vector.load %arg1[%c80, %c0_5] : memref<368x128xf32, #tpu.memory_space<vmem>>, vector<128x128xf32>
    %c208 = arith.constant 208 : index
    %c0_6 = arith.constant 0 : index
    %13 = vector.load %arg1[%c208, %c0_6] : memref<368x128xf32, #tpu.memory_space<vmem>>, vector<128x16xf32>
    %c336 = arith.constant 336 : index
    %c0_7 = arith.constant 0 : index
    %14 = vector.load %arg1[%c336, %c0_7] : memref<368x128xf32, #tpu.memory_space<vmem>>, vector<24x64xf32>
    %c360 = arith.constant 360 : index
    %c0_8 = arith.constant 0 : index
    %15 = vector.load %arg1[%c360, %c0_8] : memref<368x128xf32, #tpu.memory_space<vmem>>, vector<1x32xf32>
    %c361 = arith.constant 361 : index
    %c0_9 = arith.constant 0 : index
    %16 = vector.load %arg1[%c361, %c0_9] : memref<368x128xf32, #tpu.memory_space<vmem>>, vector<1x32xf32>
    %c362 = arith.constant 362 : index
    %c0_10 = arith.constant 0 : index
    %17 = vector.load %arg1[%c362, %c0_10] : memref<368x128xf32, #tpu.memory_space<vmem>>, vector<1x16xf32>
    %c363 = arith.constant 363 : index
    %c0_11 = arith.constant 0 : index
    %18 = vector.load %arg1[%c363, %c0_11] : memref<368x128xf32, #tpu.memory_space<vmem>>, vector<1x32xf32>
    %c364 = arith.constant 364 : index
    %c0_12 = arith.constant 0 : index
    %19 = vector.load %arg1[%c364, %c0_12] : memref<368x128xf32, #tpu.memory_space<vmem>>, vector<1x128xf32>
    %c365 = arith.constant 365 : index
    %c0_13 = arith.constant 0 : index
    %20 = vector.load %arg1[%c365, %c0_13] : memref<368x128xf32, #tpu.memory_space<vmem>>, vector<1x128xf32>
    %c366 = arith.constant 366 : index
    %c0_14 = arith.constant 0 : index
    %21 = vector.load %arg1[%c366, %c0_14] : memref<368x128xf32, #tpu.memory_space<vmem>>, vector<1x16xf32>
    %c0_15 = arith.constant 0 : index
    %c0_16 = arith.constant 0 : index
    %22 = vector.load %arg0[%c0_15, %c0_16] : memref<64x128xf32, #tpu.memory_space<vmem>>, vector<64x16xf32>
    %c0_17 = arith.constant 0 : index
    %c16_18 = arith.constant 16 : index
    %23 = vector.load %arg0[%c0_17, %c16_18] : memref<64x128xf32, #tpu.memory_space<vmem>>, vector<32x8xf32>
    %c0_19 = arith.constant 0 : index
    %c24 = arith.constant 24 : index
    %24 = vector.load %arg0[%c0_19, %c24] : memref<64x128xf32, #tpu.memory_space<vmem>>, vector<32x9xf32>
    %25 = tpu.concatenate %23, %23 in 0 : vector<32x8xf32>, vector<32x8xf32> -> vector<64x8xf32>
    %26 = tpu.iota {dimensions = array<i32: 1>} : vector<8x64xi32>
    %27 = tpu.iota {dimensions = array<i32: 0>} : vector<8x64xi32>
    %c7_i32 = arith.constant 7 : i32
    %28 = vector.broadcast %c7_i32 : i32 to vector<8x64xi32>
    %29 = arith.andi %26, %28 : vector<8x64xi32>
    %30 = arith.cmpi eq, %29, %27 : vector<8x64xi32>
    %31 = arith.extui %30 : vector<8x64xi1> to vector<8x64xi32>
    %32 = arith.sitofp %31 : vector<8x64xi32> to vector<8x64xf32>
    %cst = arith.constant dense<0.000000e+00> : vector<64x64xf32>
    %33 = tpu.matmul %25, %32, %cst {dimension_numbers = #tpu.dot_dimension_numbers<[1], [0], [0], [1], [0, 0, 1, 1], [], []>} : vector<64x8xf32>, vector<8x64xf32>, vector<64x64xf32> -> vector<64x64xf32>
    %34 = tpu.iota {dimensions = array<i32: 0>} : vector<64x64xi32>
    %35 = tpu.iota {dimensions = array<i32: 1>} : vector<64x64xi32>
    %c3_i32 = arith.constant 3 : i32
    %36 = vector.broadcast %c3_i32 : i32 to vector<64x64xi32>
    %37 = arith.shrui %34, %36 : vector<64x64xi32>
    %c3_i32_20 = arith.constant 3 : i32
    %38 = vector.broadcast %c3_i32_20 : i32 to vector<64x64xi32>
    %39 = arith.shrui %35, %38 : vector<64x64xi32>
    %40 = arith.cmpi eq, %37, %39 : vector<64x64xi32>
    %41 = arith.extui %40 : vector<64x64xi1> to vector<64x64xi32>
    %42 = arith.sitofp %41 : vector<64x64xi32> to vector<64x64xf32>
    %43 = arith.mulf %33, %42 : vector<64x64xf32>
    %cst_21 = arith.constant dense<0.000000e+00> : vector<64x32xf32>
    %44 = tpu.matmul %22, %8, %cst_21 {dimension_numbers = #tpu.dot_dimension_numbers<[1], [0], [0], [1], [0, 0, 1, 1], [], []>} : vector<64x16xf32>, vector<16x32xf32>, vector<64x32xf32> -> vector<64x32xf32>
    %cst_22 = arith.constant dense<0.000000e+00> : vector<64x32xf32>
    %45 = tpu.matmul %43, %44, %cst_22 {dimension_numbers = #tpu.dot_dimension_numbers<[1], [0], [0], [1], [0, 0, 1, 1], [], []>} : vector<64x64xf32>, vector<64x32xf32>, vector<64x32xf32> -> vector<64x32xf32>
    %46 = vector.broadcast %15 : vector<1x32xf32> to vector<64x32xf32>
    %47 = arith.addf %45, %46 : vector<64x32xf32>
    %cst_23 = arith.constant 0.000000e+00 : f32
    %48 = vector.broadcast %cst_23 : f32 to vector<64x32xf32>
    %49 = arith.cmpf ogt, %47, %48 : vector<64x32xf32>
    %50 = vector.broadcast %0 : f32 to vector<64x32xf32>
    %51 = arith.mulf %50, %47 : vector<64x32xf32>
    %52 = arith.select %49, %47, %51 : vector<64x32xi1>, vector<64x32xf32>
    %cst_24 = arith.constant dense<0.000000e+00> : vector<32x16xf32>
    %53 = tpu.matmul %24, %10, %cst_24 {dimension_numbers = #tpu.dot_dimension_numbers<[1], [0], [0], [1], [0, 0, 1, 1], [], []>} : vector<32x9xf32>, vector<9x16xf32>, vector<32x16xf32> -> vector<32x16xf32>
    %54 = vector.broadcast %17 : vector<1x16xf32> to vector<32x16xf32>
    %55 = arith.addf %53, %54 : vector<32x16xf32>
    %cst_25 = arith.constant 0.000000e+00 : f32
    %56 = vector.broadcast %cst_25 : f32 to vector<32x16xf32>
    %57 = arith.cmpf ogt, %55, %56 : vector<32x16xf32>
    %58 = vector.broadcast %2 : f32 to vector<32x16xf32>
    %59 = arith.mulf %58, %55 : vector<32x16xf32>
    %60 = arith.select %57, %55, %59 : vector<32x16xi1>, vector<32x16xf32>
    %cst_26 = arith.constant dense<0.000000e+00> : vector<32x32xf32>
    %61 = tpu.matmul %60, %11, %cst_26 {dimension_numbers = #tpu.dot_dimension_numbers<[1], [0], [0], [1], [0, 0, 1, 1], [], []>} : vector<32x16xf32>, vector<16x32xf32>, vector<32x32xf32> -> vector<32x32xf32>
    %62 = vector.broadcast %18 : vector<1x32xf32> to vector<32x32xf32>
    %63 = arith.addf %61, %62 : vector<32x32xf32>
    %cst_27 = arith.constant 0.000000e+00 : f32
    %64 = vector.broadcast %cst_27 : f32 to vector<32x32xf32>
    %65 = arith.cmpf ogt, %63, %64 : vector<32x32xf32>
    %66 = vector.broadcast %3 : f32 to vector<32x32xf32>
    %67 = arith.mulf %66, %63 : vector<32x32xf32>
    %68 = arith.select %65, %63, %67 : vector<32x32xi1>, vector<32x32xf32>
    %69 = tpu.concatenate %68, %68 in 0 : vector<32x32xf32>, vector<32x32xf32> -> vector<64x32xf32>
    %cst_28 = arith.constant 3.000000e-01 : f32
    %70 = vector.broadcast %cst_28 : f32 to vector<64x32xf32>
    %71 = arith.mulf %70, %69 : vector<64x32xf32>
    %72 = arith.addf %52, %71 : vector<64x32xf32>
    %cst_29 = arith.constant dense<0.000000e+00> : vector<64x32xf32>
    %73 = tpu.matmul %72, %9, %cst_29 {dimension_numbers = #tpu.dot_dimension_numbers<[1], [0], [0], [1], [0, 0, 1, 1], [], []>} : vector<64x32xf32>, vector<32x32xf32>, vector<64x32xf32> -> vector<64x32xf32>
    %cst_30 = arith.constant dense<0.000000e+00> : vector<64x32xf32>
    %74 = tpu.matmul %43, %73, %cst_30 {dimension_numbers = #tpu.dot_dimension_numbers<[1], [0], [0], [1], [0, 0, 1, 1], [], []>} : vector<64x64xf32>, vector<64x32xf32>, vector<64x32xf32> -> vector<64x32xf32>
    %75 = vector.broadcast %16 : vector<1x32xf32> to vector<64x32xf32>
    %76 = arith.addf %74, %75 : vector<64x32xf32>
    %cst_31 = arith.constant 0.000000e+00 : f32
    %77 = vector.broadcast %cst_31 : f32 to vector<64x32xf32>
    %78 = arith.cmpf ogt, %76, %77 : vector<64x32xf32>
    %79 = vector.broadcast %1 : f32 to vector<64x32xf32>
    %80 = arith.mulf %79, %76 : vector<64x32xf32>
    %81 = arith.select %78, %76, %80 : vector<64x32xi1>, vector<64x32xf32>
    %82 = vector.extract_strided_slice %81 {offsets = [0, 0], sizes = [32, 32], strides = [1, 1]} : vector<64x32xf32> to vector<32x32xf32>
    %83 = vector.extract_strided_slice %81 {offsets = [32, 0], sizes = [32, 32], strides = [1, 1]} : vector<64x32xf32> to vector<32x32xf32>
    %cst_32 = arith.constant 2.000000e+00 : f32
    %84 = vector.broadcast %cst_32 : f32 to vector<32x32xf32>
    %85 = arith.mulf %84, %68 : vector<32x32xf32>
    %cst_33 = arith.constant 1.000000e+00 : f32
    %86 = vector.broadcast %cst_33 : f32 to vector<32x32xf32>
    %87 = arith.addf %86, %85 : vector<32x32xf32>
    %cst_34 = arith.constant 2.000000e+00 : f32
    %88 = vector.broadcast %cst_34 : f32 to vector<32x32xf32>
    %89 = arith.mulf %88, %68 : vector<32x32xf32>
    %90 = math.exp %89 : vector<32x32xf32>
    %91 = arith.subf %87, %90 : vector<32x32xf32>
    %cst_35 = arith.constant 2.000000e+00 : f32
    %92 = vector.broadcast %cst_35 : f32 to vector<32x32xf32>
    %93 = arith.mulf %92, %91 : vector<32x32xf32>
    %94 = arith.mulf %82, %82 : vector<32x32xf32>
    %95 = arith.subf %93, %94 : vector<32x32xf32>
    %96 = arith.mulf %83, %83 : vector<32x32xf32>
    %97 = arith.subf %95, %96 : vector<32x32xf32>
    %cst_36 = arith.constant dense<0.000000e+00> : vector<32xf32>
    %98 = vector.multi_reduction <add>, %97, %cst_36 [1] : vector<32x32xf32> to vector<32xf32>
    %99 = vector.shape_cast %98 : vector<32xf32> to vector<32x1xf32>
    %cst_37 = arith.constant dense<0.000000e+00> : vector<1xf32>
    %100 = vector.multi_reduction <add>, %99, %cst_37 [0] : vector<32x1xf32> to vector<1xf32>
    %101 = vector.shape_cast %100 : vector<1xf32> to vector<1x1xf32>
    %cst_38 = arith.constant -3.05175781E-5 : f32
    %102 = vector.broadcast %cst_38 : f32 to vector<1x1xf32>
    %103 = arith.mulf %102, %101 : vector<1x1xf32>
    %cst_39 = arith.constant dense<0.000000e+00> : vector<24x32xf32>
    %104 = tpu.matmul %14, %81, %cst_39 {dimension_numbers = #tpu.dot_dimension_numbers<[1], [0], [0], [1], [0, 0, 1, 1], [], []>} : vector<24x64xf32>, vector<64x32xf32>, vector<24x32xf32> -> vector<24x32xf32>
    %c0_40 = arith.constant 0 : index
    %c0_41 = arith.constant 0 : index
    %105 = vector.load %arg2[%c0_40, %c0_41] : memref<32x256xf32, #tpu.memory_space<vmem>>, vector<32x256xf32>
    %cst_42 = arith.constant dense<0.000000e+00> : vector<24x256xf32>
    %106 = tpu.matmul %104, %105, %cst_42 {dimension_numbers = #tpu.dot_dimension_numbers<[1], [0], [0], [1], [0, 0, 1, 1], [], []>} : vector<24x32xf32>, vector<32x256xf32>, vector<24x256xf32> -> vector<24x256xf32>
    %107 = vector.extract_strided_slice %104 {offsets = [0, 0], sizes = [4, 32], strides = [1, 1]} : vector<24x32xf32> to vector<4x32xf32>
    %108 = vector.extract_strided_slice %106 {offsets = [8, 128], sizes = [4, 32], strides = [1, 1]} : vector<24x256xf32> to vector<4x32xf32>
    %109 = vector.extract_strided_slice %106 {offsets = [16, 0], sizes = [4, 128], strides = [1, 1]} : vector<24x256xf32> to vector<4x128xf32>
    %110 = vector.broadcast %19 : vector<1x128xf32> to vector<4x128xf32>
    %111 = arith.addf %109, %110 : vector<4x128xf32>
    %cst_43 = arith.constant 0.000000e+00 : f32
    %112 = vector.broadcast %cst_43 : f32 to vector<4x128xf32>
    %113 = arith.cmpf ogt, %111, %112 : vector<4x128xf32>
    %114 = vector.broadcast %4 : f32 to vector<4x128xf32>
    %115 = arith.mulf %114, %111 : vector<4x128xf32>
    %116 = arith.select %113, %111, %115 : vector<4x128xi1>, vector<4x128xf32>
    %cst_44 = arith.constant dense<0.000000e+00> : vector<4x128xf32>
    %117 = tpu.matmul %116, %12, %cst_44 {dimension_numbers = #tpu.dot_dimension_numbers<[1], [0], [0], [1], [0, 0, 1, 1], [], []>} : vector<4x128xf32>, vector<128x128xf32>, vector<4x128xf32> -> vector<4x128xf32>
    %118 = vector.broadcast %20 : vector<1x128xf32> to vector<4x128xf32>
    %119 = arith.addf %117, %118 : vector<4x128xf32>
    %cst_45 = arith.constant 0.000000e+00 : f32
    %120 = vector.broadcast %cst_45 : f32 to vector<4x128xf32>
    %121 = arith.cmpf ogt, %119, %120 : vector<4x128xf32>
    %122 = vector.broadcast %5 : f32 to vector<4x128xf32>
    %123 = arith.mulf %122, %119 : vector<4x128xf32>
    %124 = arith.select %121, %119, %123 : vector<4x128xi1>, vector<4x128xf32>
    %cst_46 = arith.constant dense<0.000000e+00> : vector<4x16xf32>
    %125 = tpu.matmul %124, %13, %cst_46 {dimension_numbers = #tpu.dot_dimension_numbers<[1], [0], [0], [1], [0, 0, 1, 1], [], []>} : vector<4x128xf32>, vector<128x16xf32>, vector<4x16xf32> -> vector<4x16xf32>
    %126 = vector.broadcast %21 : vector<1x16xf32> to vector<4x16xf32>
    %127 = arith.addf %125, %126 : vector<4x16xf32>
    %cst_47 = arith.constant 0.000000e+00 : f32
    %128 = vector.broadcast %cst_47 : f32 to vector<4x16xf32>
    %129 = arith.cmpf ogt, %127, %128 : vector<4x16xf32>
    %130 = vector.broadcast %6 : f32 to vector<4x16xf32>
    %131 = arith.mulf %130, %127 : vector<4x16xf32>
    %132 = arith.select %129, %127, %131 : vector<4x16xi1>, vector<4x16xf32>
    %133 = arith.mulf %108, %107 : vector<4x32xf32>
    %cst_48 = arith.constant dense<0.000000e+00> : vector<4xf32>
    %134 = vector.multi_reduction <add>, %133, %cst_48 [1] : vector<4x32xf32> to vector<4xf32>
    %135 = vector.shape_cast %134 : vector<4xf32> to vector<4x1xf32>
    %136 = vector.extract_strided_slice %107 {offsets = [2, 0], sizes = [1, 32], strides = [1, 1]} : vector<4x32xf32> to vector<1x32xf32>
    %137 = vector.extract_strided_slice %107 {offsets = [0, 0], sizes = [3, 32], strides = [1, 1]} : vector<4x32xf32> to vector<3x32xf32>
    %138 = tpu.concatenate %136, %137 in 0 : vector<1x32xf32>, vector<3x32xf32> -> vector<4x32xf32>
    %139 = arith.mulf %108, %138 : vector<4x32xf32>
    %cst_49 = arith.constant dense<0.000000e+00> : vector<4xf32>
    %140 = vector.multi_reduction <add>, %139, %cst_49 [1] : vector<4x32xf32> to vector<4xf32>
    %141 = vector.shape_cast %140 : vector<4xf32> to vector<4x1xf32>
    %142 = tpu.concatenate %135, %141 in 0 : vector<4x1xf32>, vector<4x1xf32> -> vector<8x1xf32>
    %143 = vector.broadcast %7 : f32 to vector<8x1xf32>
    %144 = arith.addf %142, %143 : vector<8x1xf32>
    %cst_50 = arith.constant 0.000000e+00 : f32
    %145 = vector.broadcast %cst_50 : f32 to vector<16x128xf32>
    %c0_51 = arith.constant 0 : index
    %c0_52 = arith.constant 0 : index
    %146 = vector.load %arg4[%c0_51, %c0_52] : memref<16x128xf32, #tpu.memory_space<vmem>>, vector<16x128xf32>
    tpu.vector_store %arg4[%c0_51, %c0_52], %145 {strides = array<i32>} : memref<16x128xf32, #tpu.memory_space<vmem>>, vector<16x128xf32>,
    %c0_53 = arith.constant 0 : index
    %c0_54 = arith.constant 0 : index
    %147 = vector.load %arg4[%c0_53, %c0_54] : memref<16x128xf32, #tpu.memory_space<vmem>>, vector<4x16xf32>
    tpu.vector_store %arg4[%c0_53, %c0_54], %132 {strides = array<i32>} : memref<16x128xf32, #tpu.memory_space<vmem>>, vector<4x16xf32>,
    %c4_55 = arith.constant 4 : index
    %c0_56 = arith.constant 0 : index
    %148 = vector.load %arg4[%c4_55, %c0_56] : memref<16x128xf32, #tpu.memory_space<vmem>>, vector<8x1xf32>
    tpu.vector_store %arg4[%c4_55, %c0_56], %144 {strides = array<i32>} : memref<16x128xf32, #tpu.memory_space<vmem>>, vector<8x1xf32>,
    %c12 = arith.constant 12 : index
    %c0_57 = arith.constant 0 : index
    %149 = vector.load %arg4[%c12, %c0_57] : memref<16x128xf32, #tpu.memory_space<vmem>>, vector<1x1xf32>
    tpu.vector_store %arg4[%c12, %c0_57], %103 {strides = array<i32>} : memref<16x128xf32, #tpu.memory_space<vmem>>, vector<1x1xf32>,
    return
  }
}

</mosaic_0001>

<bundles_post_ra>
// kernel: forward.1
= control target key start
LH: loop header
LB: loop body
LE: loop exit
PB: predicated region body
PF: predicated region fallthrough
CT: control target
= control target key end

     0   :  { %9 = vsyncpa [#allocation3], 0  ;;  %s2535_s0 = inlined_call_operand.vmem [shape: f32[64,128], index: 0, kind: input, shape index: {}]   ;;  %s2536_s1 = inlined_call_operand.vmem [shape: f32[368,128], index: 1, kind: input, shape index: {}]   ;;  %s2537_s2 = inlined_call_operand.vmem [shape: f32[32,256], index: 2, kind: input, shape index: {}]   ;;  %s2538_s3 = inlined_call_operand.vmem [shape: f32[8], index: 3, kind: input, shape index: {}]   ;;  %s2539_s4 = inlined_call_operand.vmem [shape: f32[16,128], index: 4, kind: output, shape index: {}]  }
   0x1   :  { %s22_s17 = sshll.u32 %s2538_s3, 4  ;;  %s23_s17 = int_to_ptr.vmem [resolvable:$true] %s22_s17 }
   0x2   :  { %s2090_s18 = scalar_lea.vmem %s23_s17, 16  ;;  %p2095_p1 = scmp.lt.s32.totalorder %s23_s17, %s23_s17 }
   0x3   :  { %p2091_p0 = scmp.ne.s32.totalorder %s23_s17, %s2090_s18  ;;  %p2096_p2 = scmp.lt.s32.totalorder %s2090_s18, %s2090_s18 }
   0x5   :  { %p2097_p3 = por %p2096_p2, %p2095_p1 }
   0x7   :  { %p2098_p4 = pnand %p2097_p3, %p2091_p0 }
   0x9   :  { %2101 = shalt.err (!%p2098_p4)
}
   0xa   :  { %s2104_s19 = smov [#allocation2]  }
   0xb   :  { %25 = dma.vmem_to_smem %s23_s17, 16, %s2104_s19, [#allocation3]  }
   0xc   :  { %2102 = dma.done.wait [#allocation3], 16  }
   0xd   :  { %2103 = vsyncadd [#allocation3], 4294967280 }
   0xe   :  { %29 = sfence }
   0xf   :  { %v98_v0 = vld [vmem:[%s2535_s0] sm:$0xff]  ;;  %v100_v1 = vld [vmem:[%s2535_s0 + $0x10] sm:$0xff]  ;;  %vm284_vm0 = vcmask 130048   ;;  %v102_v2 = vlaneseq  ;;  %s2105_s3 = smov 112   ;;  %v99_v4 = vld [vmem:[%s2535_s0 + $0x8] sm:$0xff]  ;;  %v2106_v11 = vmov 1.0  }
  0x10   :  { %114 = vrot.lane.b32.xlu0 %v98_v0, %s2105_s3  ;;  %118 = vrot.lane.b32.xlu1 %v100_v1, %s2105_s3  ;;  %v38_v3 = vld [vmem:[%s2536_s1] sm:$0xff]  ;;  %v101_v5 = vld [vmem:[%s2535_s0 + $0x18] sm:$0xff]  ;;  %s2107_s6 = smov 104   ;;  %vm122_vm2 = vcmask 64512   ;;  %v2108_v20 = vmov 0.0   ;;  %vm594_vm3 = vcmask 1040384  }
  0x11   :  { %v39_v6 = vld [vmem:[%s2536_s1 + $0x8] sm:$0xff]  ;;  %1749 = vmatprep.mubr.msk.f32.mxu1 %vm284_vm0, %v98_v0  ;;  %v2159_v7 = vand.u32 127, %v102_v2  ;;  %v2161_v8 = vshrl.u32 %v102_v2, 7  ;;  %v94_v12 = vld [vmem:[%s2535_s0 + $0x20] sm:$0xff]  ;;  %v96_v14 = vld [vmem:[%s2535_s0 + $0x30] sm:$0xff]  ;;  %1519 = vst [vmem:[%s2539_s4] sm:$0xff] %v2108_v20  ;;  %vm2109_vm4 = vmmov 1  }
  0x12   :  { %v1952_v9 = vpack.c.bf16 %v39_v6, %v38_v3  ;;  %v95_v13 = vld [vmem:[%s2535_s0 + $0x28] sm:$0xff]  ;;  %v97_v15 = vld [vmem:[%s2535_s0 + $0x38] sm:$0xff]  ;;  %1520 = vst [vmem:[%s2539_s4 + $0x8] sm:$0xff] %v2108_v20  ;;  %v44_v30 = vld [vmem:[%s2536_s1 + $0x30] sm:$0xff]  ;;  %vm418_vm10 = vcmask 523264   ;;  %vm585_vm15 = vcmask 72704  }
  0x13   :  { %v106_v10 = vand.u32 7, %v2159_v7  ;;  %v45_v31 = vld [vmem:[%s2536_s1 + $0x38] sm:$0x1]  ;;  %vm2199_vm5 = vmpackc.low %vm594_vm3, %vm2109_vm4  ;;  %v236_v37 = vadd.s32 8, %v2161_v8  ;;  %v251_v38 = vshrl.u32 %v2159_v7, 3  ;;  %v238_v40 = vadd.s32 24, %v2161_v8 }
  0x14   :  { %116 = vrot.lane.b32.xlu0 %v99_v4, %s2105_s3  ;;  %120 = vrot.lane.b32.xlu1 %v101_v5, %s2105_s3  ;;  %v1972_v35 = vpack.c.bf16 %v45_v31, %v44_v30  ;;  %v243_v41 = vshrl.u32 %v2161_v8, 3  ;;  %v237_v42 = vadd.s32 16, %v2161_v8  ;;  %v240_v44 = vadd.s32 40, %v2161_v8  ;;  %s1533_s25 = sld [smem:[#allocation2 + $0x2]]  ;;  %s30_s10 = sld [smem:[#allocation2]] }
  0x15   :  { %1953 = vmatprep.subr.bf16.mxu1 %v1952_v9  ;;  %vm107_vm1 = vcmp.eq.s32.totalorder %v106_v10, %v2161_v8  ;;  %v244_v39 = vshrl.u32 %v236_v37, 3  ;;  %v246_v43 = vshrl.u32 %v238_v40, 3  ;;  %v239_v46 = vadd.s32 32, %v2161_v8  ;;  %s1534_s13 = sld [smem:[#allocation2 + $0x3]]  ;;  %s1532_s16 = sld [smem:[#allocation2 + $0x1]] }
  0x16   :  { %1955 = vmatpush3.bf16.msra.mxu1 %v1952_v9  ;;  %1731 = vmatprep.subr.msk.mxu0 %vm107_vm1, %v2106_v11  ;;  %vm252_vm7 = vcmp.eq.s32.totalorder %v243_v41, %v251_v38  ;;  %v245_v45 = vshrl.u32 %v237_v42, 3  ;;  %v248_v49 = vshrl.u32 %v240_v44, 3  ;;  %v242_v50 = vadd.s32 56, %v2161_v8  ;;  %s1535_s17 = sld [smem:[#allocation2 + $0x4]]  ;;  %s1538_s22 = sld [smem:[#allocation2 + $0x7]] }
  0x17   :  { %1732 = vmatpush3.msk.msra.mxu0 %vm107_vm1, %v2106_v11  ;;  %vm253_vm6 = vcmp.eq.s32.totalorder %v244_v39, %v251_v38  ;;  %v1549_v48 = vsel %vm252_vm7, 1.0, %v2108_v20  ;;  %vm255_vm8 = vcmp.eq.s32.totalorder %v246_v43, %v251_v38  ;;  %v247_v52 = vshrl.u32 %v239_v46, 3  ;;  %s1536_s24 = sld [smem:[#allocation2 + $0x5]]  ;;  %s1537_s27 = sld [smem:[#allocation2 + $0x6]] }
  0x18   :  { %577 = vrot.lane.b32.xlu0 %v98_v0, %s2107_s6  ;;  %579 = vrot.lane.b32.xlu1 %v99_v4, %s2107_s6  ;;  %v1550_v47 = vsel %vm253_vm6, 1.0, %v2108_v20  ;;  %vm254_vm9 = vcmp.eq.s32.totalorder %v245_v45, %v251_v38  ;;  %v241_v53 = vadd.s32 48, %v2161_v8  ;;  %v1552_v57 = vsel %vm255_vm8, 1.0, %v2108_v20 }
  0x19   :  { %1750 = vmatmul.mubr.msk.f32.vlgmr.msra.gmra.mrb[0].mxu1 %vm284_vm0, %v99_v4  ;;  %v1551_v58 = vsel %vm254_vm9, 1.0, %v2108_v20  ;;  %vm257_vm11 = vcmp.eq.s32.totalorder %v248_v49, %v251_v38  ;;  %v250_v59 = vshrl.u32 %v242_v50, 3  ;;  %vm256_vm12 = vcmp.eq.s32.totalorder %v247_v52, %v251_v38  ;;  %v42_v50 = vld [vmem:[%s2536_s1 + $0x20] sm:$0xff] }
  0x1a   :  { %1752 = vmatprep.mubr.msk.f32.mxu1 %vm284_vm0, %v100_v1  ;;  %v249_v61 = vshrl.u32 %v241_v53, 3  ;;  %v1553_v2 = vsel %vm256_vm12, 1.0, %v2108_v20  ;;  %v687_v31 = vstv %s1533_s25  ;;  %v1565_v53 = vld [vmem:[%s2536_s1 + $0x168] ss:$0 sm:$0xff] }
  0x1b   :  { %vm259_vm13 = vcmp.eq.s32.totalorder %v250_v59, %v251_v38 }
  0x1c   :  { %581 = vrot.lane.b32.xlu0 %v100_v1, %s2107_s6  ;;  %583 = vrot.lane.b32.xlu1 %v101_v5, %s2107_s6  ;;  %v1554_v1 = vsel %vm257_vm11, 1.0, %v2108_v20  ;;  %vm258_vm14 = vcmp.eq.s32.totalorder %v249_v61, %v251_v38  ;;  %v1556_v7 = vsel %vm259_vm13, 1.0, %v2108_v20  ;;  %v1580_v61 = vld [vmem:[%s2536_s1 + $0x16b] ss:$0 sm:$0xff] }
  0x1d   :  { %1753 = vmatmul.mubr.msk.f32.gmra.mrb[2].mxu1 %vm284_vm0, %v101_v5  ;;  %v1555_v8 = vsel %vm258_vm14, 1.0, %v2108_v20 }
  0x1e   :  { %1755 = vmatprep.mubr.msk.f32.mxu1 %vm284_vm0, %v94_v12 }
  0x21   :  { %1756 = vmatmul.mubr.msk.f32.gmra.mrb[4].mxu1 %vm284_vm0, %v95_v13 }
  0x22   :  { %1758 = vmatprep.mubr.msk.f32.mxu1 %vm284_vm0, %v96_v14 }
  0x25   :  { %1759 = vmatmul.mubr.msk.f32.gmra.mrb[6].mxu1 %vm284_vm0, %v97_v15 }
  0x82   :  { %v115_v16 = vpop.permute.xlu0 %114  ;;  %v119_v17 = vpop.permute.xlu1 %118 }
  0x83   :  { %1733 = vmatprep.mubr.msk.f32.mxu0 %vm122_vm2, %v115_v16 }
  0x86   :  { %v117_v18 = vpop.permute.xlu0 %116  ;;  %v121_v19 = vpop.permute.xlu1 %120 }
  0x87   :  { %1734 = vmatmul.mubr.msk.f32.vlgmr.msra.gmra.mrb[0].mxu0 %vm122_vm2, %v117_v18 }
  0x88   :  { %1736 = vmatprep.mubr.msk.f32.mxu0 %vm122_vm2, %v119_v17 }
  0x8a   :  { %v578_v12 = vpop.permute.xlu0 %577  ;;  %v580_v14 = vpop.permute.xlu1 %579 }
  0x8b   :  { %1737 = vmatmul.mubr.msk.f32.gmra.mrb[2].mxu0 %vm122_vm2, %v121_v19 }
  0x8c   :  { %1739 = vmatprep.mubr.msk.f32.mxu0 %vm122_vm2, %v115_v16 }
  0x8e   :  { %v582_v15 = vpop.permute.xlu0 %581  ;;  %v584_v16 = vpop.permute.xlu1 %583 }
  0x8f   :  { %1740 = vmatmul.mubr.msk.f32.gmra.mrb[4].mxu0 %vm122_vm2, %v117_v18  ;;  %v47_v18 = vld [vmem:[%s2536_s1 + $0x48] sm:$0xff] }
  0x90   :  { %1742 = vmatprep.mubr.msk.f32.mxu0 %vm122_vm2, %v119_v17  ;;  %v46_v17 = vld [vmem:[%s2536_s1 + $0x40] sm:$0xff] }
  0x93   :  { %1743 = vmatmul.mubr.msk.f32.gmra.mrb[6].mxu0 %vm122_vm2, %v121_v19  ;;  %v1978_v19 = vpack.c.bf16 %v47_v18, %v46_v17 }
  0x95   :  { %1979 = vmatprep.subr.bf16.mxu1 %v1978_v19 }
  0x96   :  { %1981 = vmatpush3.bf16.msra.mxu1 %v1978_v19 }
  0xec   :  { %v1751_v21 = vpop.f32.mrb[0].mxu1 }
  0xed   :  { %v375_v22 = vpop.f32.mrb[1].mxu1 }
  0xee   :  { %v1956_v23 = vpack.c.bf16 %v1751_v21, %v375_v22 }
  0xf0   :  { %v1754_v24 = vpop.f32.mrb[2].mxu1  ;;  %1957 = vmatprep.subr.bf16.mxu0 %v1956_v23 }
  0xf1   :  { %v385_v25 = vpop.f32.mrb[3].mxu1  ;;  %1959 = vmatpush3.bf16.msra.mxu0 %v1956_v23 }
  0xf2   :  { %v1960_v26 = vpack.c.bf16 %v1754_v24, %v385_v25 }
  0xf4   :  { %v1757_v27 = vpop.f32.mrb[4].mxu1  ;;  %1961 = vmatprep.subr.bf16.mxu0 %v1960_v26 }
  0xf5   :  { %v395_v28 = vpop.f32.mrb[5].mxu1  ;;  %1963 = vmatpush3.bf16.msra.mxu0 %v1960_v26 }
  0xf6   :  { %v1964_v29 = vpack.c.bf16 %v1757_v27, %v395_v28 }
  0xf8   :  { %v1760_v32 = vpop.f32.mrb[6].mxu1  ;;  %1965 = vmatprep.subr.bf16.mxu0 %v1964_v29 }
  0xf9   :  { %v405_v33 = vpop.f32.mrb[7].mxu1  ;;  %1967 = vmatpush3.bf16.msra.mxu0 %v1964_v29  ;;  %v1574_v29 = vld [vmem:[%s2536_s1 + $0x16a] ss:$0 sm:$0xff] }
  0xfa   :  { %v1968_v34 = vpack.c.bf16 %v1760_v32, %v405_v33 }
  0xfc   :  { %1969 = vmatprep.subr.bf16.mxu0 %v1968_v34 }
  0xfd   :  { %1971 = vmatpush3.bf16.msra.mxu0 %v1968_v34 }
  0xfe   :  { %1974 = vmatprep.subr.msk.bf16.mxu0 %vm2199_vm5, %v1972_v35 }
 0x15a   :  { %v1735_v51 = vpop.f32.mrb[0].mxu0 }
 0x15b   :  { %v2216_v54 = vmul.f32 %v1735_v51, %v1550_v47  ;;  %v197_v55 = vpop.f32.mrb[1].mxu0  ;;  %v40_v47 = vld [vmem:[%s2536_s1 + $0x10] sm:$0xff]  ;;  %v43_v51 = vld [vmem:[%s2536_s1 + $0x28] sm:$0xff] }
 0x15c   :  { %v2218_v56 = vmul.f32 %v1549_v48, %v197_v55  ;;  %v41_v48 = vld [vmem:[%s2536_s1 + $0x18] sm:$0xff]  ;;  %v1986_v52 = vpack.c.bf16 %v43_v51, %v42_v50 }
 0x15d   :  { %v1982_v49 = vpack.c.bf16 %v41_v48, %v40_v47 }
 0x15e   :  { %v1738_v60 = vpop.f32.mrb[2].mxu0  ;;  %1777 = vmatprep.mubr.msk.f32.mxu0 %vm418_vm10, %v2218_v56 }
 0x15f   :  { %v2224_v62 = vmul.f32 %v1738_v60, %v1552_v57  ;;  %v207_v63 = vpop.f32.mrb[3].mxu0  ;;  %1778 = vmatmul.mubr.msk.f32.vlgmr.msra.gmra.mrb[8].mxu0 %vm418_vm10, %v2216_v54 }
 0x160   :  { %v2228_v0 = vmul.f32 %v1551_v58, %v207_v63  ;;  %1977 = vmatpush3.bf16.msk.msra.mxu0 %vm2199_vm5, %v1972_v35 }
 0x161   :  { %1983 = vmatprep.subr.bf16.mxu0 %v1982_v49 }
 0x162   :  { %v1741_v3 = vpop.f32.mrb[4].mxu0  ;;  %1780 = vmatprep.mubr.msk.f32.mxu0 %vm418_vm10, %v2228_v0 }
 0x163   :  { %v2236_v4 = vmul.f32 %v1741_v3, %v1554_v1  ;;  %v217_v5 = vpop.f32.mrb[5].mxu0  ;;  %1781 = vmatmul.mubr.msk.f32.gmra.mrb[10].mxu0 %vm418_vm10, %v2224_v62  ;;  %v801_v3 = vstv %s1534_s13 }
 0x164   :  { %v2240_v6 = vmul.f32 %v1553_v2, %v217_v5 }
 0x166   :  { %v1744_v9 = vpop.f32.mrb[6].mxu0  ;;  %1783 = vmatprep.mubr.msk.f32.mxu0 %vm418_vm10, %v2240_v6 }
 0x167   :  { %v2246_v10 = vmul.f32 %v1744_v9, %v1556_v7  ;;  %v227_v11 = vpop.f32.mrb[7].mxu0  ;;  %1784 = vmatmul.mubr.msk.f32.gmra.mrb[12].mxu0 %vm418_vm10, %v2236_v4 }
 0x168   :  { %v2250_v13 = vmul.f32 %v1555_v8, %v227_v11 }
 0x16a   :  { %1786 = vmatprep.mubr.msk.f32.mxu0 %vm418_vm10, %v2250_v13 }
 0x16b   :  { %1787 = vmatmul.mubr.msk.f32.gmra.mrb[14].mxu0 %vm418_vm10, %v2246_v10 }
 0x16c   :  { %1793 = vmatprep.mubr.msk.f32.mxu0 %vm585_vm15, %v578_v12 }
 0x16f   :  { %1794 = vmatmul.mubr.msk.f32.vlgmr.msra.gmra.mrb[16].mxu0 %vm585_vm15, %v580_v14 }
 0x170   :  { %1796 = vmatprep.mubr.msk.f32.mxu0 %vm585_vm15, %v582_v15  ;;  %1985 = vmatpush3.bf16.msra.mxu0 %v1982_v49 }
 0x171   :  { %1987 = vmatprep.subr.bf16.mxu0 %v1986_v52 }
 0x173   :  { %1797 = vmatmul.mubr.msk.f32.gmra.mrb[18].mxu0 %vm585_vm15, %v584_v16 }
 0x174   :  { %1989 = vmatpush3.bf16.msra.mxu0 %v1986_v52 }
 0x232   :  { %v1779_v21 = vpop.f32.mrb[8].mxu0 }
 0x233   :  { %v509_v22 = vpop.f32.mrb[9].mxu0  ;;  %v515_v55 = vadd.f32 %v1779_v21, %v1565_v53 }
 0x234   :  { %v510_v57 = vadd.f32 %v1565_v53, %v509_v22 }
 0x236   :  { %v1782_v23 = vpop.f32.mrb[10].mxu0  ;;  %vm548_vm6 = vcmp.gt.f32.partialorder %v510_v57, 0.0 }
 0x237   :  { %v519_v24 = vpop.f32.mrb[11].mxu0  ;;  %v525_v60 = vadd.f32 %v1782_v23, %v1565_v53 }
 0x238   :  { %v520_v63 = vadd.f32 %v1565_v53, %v519_v24 }
 0x239   :  { %vm551_vm7 = vcmp.gt.f32.partialorder %v525_v60, 0.0 }
 0x23a   :  { %v1785_v25 = vpop.f32.mrb[12].mxu0  ;;  %vm550_vm8 = vcmp.gt.f32.partialorder %v520_v63, 0.0 }
 0x23b   :  { %v529_v26 = vpop.f32.mrb[13].mxu0  ;;  %v535_v1 = vadd.f32 %v1785_v25, %v1565_v53 }
 0x23c   :  { %v530_v7 = vadd.f32 %v1565_v53, %v529_v26 }
 0x23d   :  { %vm553_vm12 = vcmp.gt.f32.partialorder %v535_v1, 0.0 }
 0x23e   :  { %v2262_v27 = vpop.f32.mrb[14].mxu0  ;;  %vm552_vm13 = vcmp.gt.f32.partialorder %v530_v7, 0.0 }
 0x23f   :  { %v2264_v28 = vpop.f32.mrb[15].mxu0  ;;  %v545_v18 = vadd.f32 %v2262_v27, %v1565_v53 }
 0x240   :  { %v540_v26 = vadd.f32 %v1565_v53, %v2264_v28 }
 0x242   :  { %v1795_v30 = vpop.f32.mrb[16].mxu0 }
 0x243   :  { %v670_v32 = vadd.f32 %v1795_v30, %v1574_v29  ;;  %v664_v33 = vpop.f32.mrb[17].mxu0 }
 0x244   :  { %v665_v34 = vadd.f32 %v1574_v29, %v664_v33 }
 0x245   :  { %v689_v35 = vmul.f32 %v687_v31, %v670_v32  ;;  %vm684_vm1 = vcmp.gt.f32.partialorder %v670_v32, 0.0 }
 0x246   :  { %vm683_vm2 = vcmp.gt.f32.partialorder %v665_v34, 0.0  ;;  %v688_v36 = vmul.f32 %v687_v31, %v665_v34  ;;  %v1798_v37 = vpop.f32.mrb[18].mxu0 }
 0x247   :  { %v680_v38 = vadd.f32 %v1798_v37, %v1574_v29  ;;  %v674_v39 = vpop.f32.mrb[19].mxu0  ;;  %v693_v42 = vsel %vm684_vm1, %v670_v32, %v689_v35  ;;  %vm555_vm1 = vcmp.gt.f32.partialorder %v545_v18, 0.0 }
 0x248   :  { %v675_v40 = vadd.f32 %v1574_v29, %v674_v39  ;;  %v692_v41 = vsel %vm683_vm2, %v665_v34, %v688_v36  ;;  %vm822_vm2 = vcmask 261120  }
 0x249   :  { %v691_v43 = vmul.f32 %v687_v31, %v680_v38  ;;  %1803 = vmatprep.mubr.msk.f32.mxu1 %vm284_vm0, %v692_v41  ;;  %vm686_vm4 = vcmp.gt.f32.partialorder %v680_v38, 0.0 }
 0x24a   :  { %vm685_vm5 = vcmp.gt.f32.partialorder %v675_v40, 0.0  ;;  %v690_v44 = vmul.f32 %v687_v31, %v675_v40  ;;  %1804 = vmatmul.mubr.msk.f32.vlgmr.msra.gmra.mrb[8].mxu1 %vm284_vm0, %v693_v42 }
 0x24b   :  { %v695_v46 = vsel %vm686_vm4, %v680_v38, %v691_v43  ;;  %vm554_vm4 = vcmp.gt.f32.partialorder %v540_v26, 0.0 }
 0x24c   :  { %v694_v45 = vsel %vm685_vm5, %v675_v40, %v690_v44  ;;  %vm2111_vm5 = vmmov 0  }
 0x24d   :  { %1806 = vmatprep.mubr.msk.f32.mxu1 %vm284_vm0, %v694_v45 }
 0x24e   :  { %1807 = vmatmul.mubr.msk.f32.gmra.mrb[10].mxu1 %vm284_vm0, %v695_v46  ;;  %vm549_vm0 = vcmp.gt.f32.partialorder %v515_v55, 0.0 }
 0x24f   :  { %1845 = vmatprep.mubr.msk.f32.mxu1 %vm418_vm10, %v2218_v56  ;;  %v556_v56 = vstv %s30_s10 }
 0x250   :  { %v558_v58 = vmul.f32 %v556_v56, %v515_v55  ;;  %v557_v59 = vmul.f32 %v556_v56, %v510_v57  ;;  %v560_v12 = vmul.f32 %v556_v56, %v525_v60  ;;  %v559_v15 = vmul.f32 %v556_v56, %v520_v63 }
 0x251   :  { %v562_v17 = vmul.f32 %v556_v56, %v535_v1  ;;  %v561_v22 = vmul.f32 %v556_v56, %v530_v7  ;;  %v564_v34 = vmul.f32 %v556_v56, %v545_v18  ;;  %v563_v38 = vmul.f32 %v556_v56, %v540_v26 }
 0x252   :  { %v566_v5 = vsel %vm549_vm0, %v515_v55, %v558_v58  ;;  %v565_v11 = vsel %vm548_vm6, %v510_v57, %v557_v59  ;;  %v568_v44 = vsel %vm551_vm7, %v525_v60, %v560_v12  ;;  %v567_v47 = vsel %vm550_vm8, %v520_v63, %v559_v15  ;;  %v1593_v12 = vld [vmem:[%s2536_s1 + $0x169] ss:$0 sm:$0xff] }
 0x253   :  { %v570_v33 = vsel %vm553_vm12, %v535_v1, %v562_v17  ;;  %v569_v28 = vsel %vm552_vm13, %v530_v7, %v561_v22  ;;  %v572_v45 = vsel %vm555_vm1, %v545_v18, %v564_v34  ;;  %v571_v50 = vsel %vm554_vm4, %v540_v26, %v563_v38 }
 0x254   :  { %vm1523_vm1 = vcmask 7168  }
 0x31d   :  { %v1805_v2 = vpop.f32.mrb[8].mxu1 }
 0x31e   :  { %v784_v8 = vadd.f32 %v1805_v2, %v1580_v61  ;;  %v778_v9 = vpop.f32.mrb[9].mxu1 }
 0x31f   :  { %v779_v14 = vadd.f32 %v1580_v61, %v778_v9 }
 0x320   :  { %vm798_vm9 = vcmp.gt.f32.partialorder %v784_v8, 0.0  ;;  %v803_v16 = vmul.f32 %v801_v3, %v784_v8 }
 0x321   :  { %vm797_vm11 = vcmp.gt.f32.partialorder %v779_v14, 0.0  ;;  %v802_v19 = vmul.f32 %v801_v3, %v779_v14  ;;  %v1808_v21 = vpop.f32.mrb[10].mxu1 }
 0x322   :  { %v2294_v23 = vsel %vm798_vm9, %v784_v8, %v803_v16  ;;  %v794_v24 = vadd.f32 %v1808_v21, %v1580_v61  ;;  %v788_v25 = vpop.f32.mrb[11].mxu1  ;;  %v2338_v16 = vstv %s1532_s16 }
 0x323   :  { %v811_v29 = vmul.f32 0.3, %v2294_v23  ;;  %v2298_v30 = vsel %vm797_vm11, %v779_v14, %v802_v19  ;;  %v789_v31 = vadd.f32 %v1580_v61, %v788_v25 }
 0x324   :  { %v810_v32 = vmul.f32 0.3, %v2298_v30  ;;  %vm800_vm14 = vcmp.gt.f32.partialorder %v794_v24, 0.0  ;;  %v805_v27 = vmul.f32 %v801_v3, %v794_v24 }
 0x325   :  { %v815_v35 = vadd.f32 %v811_v29, %v566_v5  ;;  %vm799_vm15 = vcmp.gt.f32.partialorder %v789_v31, 0.0  ;;  %v804_v37 = vmul.f32 %v801_v3, %v789_v31  ;;  %v819_v43 = vadd.f32 %v811_v29, %v570_v33 }
 0x326   :  { %v2301_v36 = vsel %vm800_vm14, %v794_v24, %v805_v27  ;;  %v814_v40 = vadd.f32 %v810_v32, %v565_v11  ;;  %v818_v42 = vadd.f32 %v810_v32, %v569_v28  ;;  %vm1499_vm14 = vcmask 257024  }
 0x327   :  { %v813_v39 = vmul.f32 0.3, %v2301_v36  ;;  %v808_v41 = vsel %vm799_vm15, %v789_v31, %v804_v37 }
 0x328   :  { %v812_v46 = vmul.f32 0.3, %v808_v41  ;;  %1817 = vmatprep.mubr.msk.f32.mxu0 %vm822_vm2, %v814_v40  ;;  %v1088_v5 = vmul.f32 2.0, %v808_v41 }
 0x329   :  { %1818 = vmatmul.mubr.msk.f32.vlgmr.msra.gmra.mrb[20].mxu0 %vm822_vm2, %v815_v35  ;;  %v817_v48 = vadd.f32 %v813_v39, %v568_v44  ;;  %v821_v49 = vadd.f32 %v813_v39, %v572_v45 }
 0x32a   :  { %v816_v51 = vadd.f32 %v812_v46, %v567_v47  ;;  %v820_v52 = vadd.f32 %v812_v46, %v571_v50  ;;  %v1098_v7 = vmul.f32 1.442695, %v1088_v5  ;;  %v1092_v29 = vadd.f32 1.0, %v1088_v5 }
 0x32c   :  { %1820 = vmatprep.mubr.msk.f32.mxu0 %vm822_vm2, %v816_v51 }
 0x32d   :  { %1821 = vmatmul.mubr.msk.f32.gmra.mrb[22].mxu0 %vm822_vm2, %v817_v48 }
 0x32e   :  { %1823 = vmatprep.mubr.msk.f32.mxu0 %vm822_vm2, %v818_v42 }
 0x331   :  { %1824 = vmatmul.mubr.msk.f32.gmra.mrb[24].mxu0 %vm822_vm2, %v819_v43 }
 0x332   :  { %1826 = vmatprep.mubr.msk.f32.mxu0 %vm822_vm2, %v820_v52 }
 0x335   :  { %1827 = vmatmul.mubr.msk.f32.gmra.mrb[26].mxu0 %vm822_vm2, %v821_v49 }
 0x336   :  { %1873 = vmatprep.mubr.msk.f32.mxu0 %vm2111_vm5, %v2108_v20 }
 0x3fc   :  { %v1819_v53 = vpop.f32.mrb[20].mxu0 }
 0x3fd   :  { %v913_v55 = vpop.f32.mrb[21].mxu0 }
 0x3fe   :  { %v1990_v56 = vpack.c.bf16 %v1819_v53, %v913_v55 }
 0x400   :  { %v1822_v57 = vpop.f32.mrb[22].mxu0  ;;  %1991 = vmatprep.subr.bf16.mxu1 %v1990_v56 }
 0x401   :  { %v923_v58 = vpop.f32.mrb[23].mxu0  ;;  %1993 = vmatpush3.bf16.msra.mxu1 %v1990_v56 }
 0x402   :  { %v1994_v59 = vpack.c.bf16 %v1822_v57, %v923_v58 }
 0x404   :  { %v1825_v60 = vpop.f32.mrb[24].mxu0  ;;  %1995 = vmatprep.subr.bf16.mxu1 %v1994_v59 }
 0x405   :  { %v933_v61 = vpop.f32.mrb[25].mxu0  ;;  %1997 = vmatpush3.bf16.msra.mxu1 %v1994_v59 }
 0x406   :  { %v1998_v63 = vpack.c.bf16 %v1825_v60, %v933_v61 }
 0x408   :  { %v1828_v1 = vpop.f32.mrb[26].mxu0  ;;  %1999 = vmatprep.subr.bf16.mxu1 %v1998_v63 }
 0x409   :  { %v943_v2 = vpop.f32.mrb[27].mxu0  ;;  %2001 = vmatpush3.bf16.msra.mxu1 %v1998_v63 }
 0x40a   :  { %v2002_v3 = vpack.c.bf16 %v1828_v1, %v943_v2 }
 0x40c   :  { %2003 = vmatprep.subr.bf16.mxu1 %v2002_v3 }
 0x40d   :  { %2005 = vmatpush3.bf16.msra.mxu1 %v2002_v3 }
 0x410   :  { %1846 = vmatmul.mubr.msk.f32.vlgmr.msra.gmra.mrb[12].mxu1 %vm418_vm10, %v2216_v54  ;;  %v2110_v54 = vmov 0.0|0.0  }
 0x411   :  { %1848 = vmatprep.mubr.msk.f32.mxu1 %vm418_vm10, %v2228_v0  ;;  %2006 = vmatprep.subr.bf16.mxu0 %v2110_v54  ;;  %v1086_v0 = vmul.f32 2.0, %v2298_v30 }
 0x413   :  { %v1090_v14 = vadd.f32 1.0, %v1086_v0 }
 0x414   :  { %1849 = vmatmul.mubr.msk.f32.gmra.mrb[14].mxu1 %vm418_vm10, %v2224_v62  ;;  %v1087_v62 = vmul.f32 2.0, %v2294_v23 }
 0x415   :  { %1851 = vmatprep.mubr.msk.f32.mxu1 %vm418_vm10, %v2240_v6  ;;  %v1094_v6 = vmul.f32 1.442695, %v1086_v0 }
 0x416   :  { %v1091_v11 = vadd.f32 1.0, %v1087_v62 }
 0x418   :  { %1852 = vmatmul.mubr.msk.f32.gmra.mrb[16].mxu1 %vm418_vm10, %v2236_v4  ;;  %v1096_v4 = vmul.f32 1.442695, %v1087_v62 }
 0x419   :  { %1854 = vmatprep.mubr.msk.f32.mxu1 %vm418_vm10, %v2250_v13  ;;  %v1089_v13 = vmul.f32 2.0, %v2301_v36 }
 0x41a   :  { %2082 = vpow2.f32 %v1096_v4 }
 0x41b   :  { %2084 = vpow2.f32 %v1094_v6  ;;  %v1093_v25 = vadd.f32 1.0, %v1089_v13 }
 0x41c   :  { %1855 = vmatmul.mubr.msk.f32.gmra.mrb[18].mxu1 %vm418_vm10, %v2246_v10  ;;  %v1100_v10 = vmul.f32 1.442695, %v1089_v13 }
 0x41d   :  { %1318 = vmatprep.mubr.f32.mxu1 %v2108_v20 }
 0x41e   :  { %2086 = vpow2.f32 %v1100_v10 }
 0x41f   :  { %2088 = vpow2.f32 %v1098_v7 }
 0x424   :  { %v2083_v8 = vpop.eup %2082 }
 0x425   :  { %v2085_v9 = vpop.eup %2084  ;;  %v1103_v17 = vsub.f32 %v1091_v11, %v2083_v8 }
 0x426   :  { %v1102_v21 = vsub.f32 %v1090_v14, %v2085_v9 }
 0x427   :  { %v1107_v32 = vmul.f32 2.0, %v1103_v17 }
 0x428   :  { %v2087_v22 = vpop.eup %2086  ;;  %v1106_v35 = vmul.f32 2.0, %v1102_v21 }
 0x429   :  { %v2089_v24 = vpop.eup %2088  ;;  %v1105_v36 = vsub.f32 %v1093_v25, %v2087_v22  ;;  %v82_v25 = vld [vmem:[%s2536_s1 + $0x160] sm:$0xff] }
 0x42a   :  { %v1104_v39 = vsub.f32 %v1092_v29, %v2089_v24  ;;  %v1240_v29 = vld [vmem:[%s2537_s2 + $0x18] sm:$0xff] }
 0x42b   :  { %v1109_v50 = vmul.f32 2.0, %v1105_v36  ;;  %v1241_v36 = vld [vmem:[%s2537_s2 + $0x20] sm:$0xff] }
 0x42c   :  { %v1108_v55 = vmul.f32 2.0, %v1104_v39  ;;  %v49_v39 = vld [vmem:[%s2536_s1 + $0x58] sm:$0xff] }
 0x4e3   :  { %v1847_v15 = vpop.f32.mrb[12].mxu1 }
 0x4e4   :  { %v1028_v18 = vadd.f32 %v1847_v15, %v1593_v12  ;;  %v1022_v19 = vpop.f32.mrb[13].mxu1 }
 0x4e5   :  { %v1023_v23 = vadd.f32 %v1593_v12, %v1022_v19 }
 0x4e6   :  { %vm1062_vm0 = vcmp.gt.f32.partialorder %v1028_v18, 0.0  ;;  %v1071_v26 = vmul.f32 %v2338_v16, %v1028_v18 }
 0x4e7   :  { %vm1061_vm6 = vcmp.gt.f32.partialorder %v1023_v23, 0.0  ;;  %v1070_v30 = vmul.f32 %v2338_v16, %v1023_v23  ;;  %v1850_v31 = vpop.f32.mrb[14].mxu1 }
 0x4e8   :  { %v1079_v27 = vsel %vm1062_vm0, %v1028_v18, %v1071_v26  ;;  %v1038_v33 = vadd.f32 %v1850_v31, %v1593_v12  ;;  %v1032_v34 = vpop.f32.mrb[15].mxu1  ;;  %v1238_v26 = vld [vmem:[%s2537_s2 + $0x8] sm:$0xff] }
 0x4e9   :  { %v1111_v37 = vmul.f32 %v1079_v27, %v1079_v27  ;;  %v1078_v28 = vsel %vm1061_vm6, %v1023_v23, %v1070_v30  ;;  %v1033_v38 = vadd.f32 %v1593_v12, %v1032_v34  ;;  %v81_v23 = vld [vmem:[%s2536_s1 + $0x158] sm:$0xff]  ;;  %v1237_v30 = vld [vmem:[%s2537_s2] sm:$0xff]  ;;  %v2018_v31 = vpack.c.bf16 %v1240_v29, %v1238_v26 }
 0x4ea   :  { %v1110_v40 = vmul.f32 %v1078_v28, %v1078_v28  ;;  %v2007_v41 = vpack.c.bf16 %v1079_v27, %v1078_v28  ;;  %vm1064_vm7 = vcmp.gt.f32.partialorder %v1038_v33, 0.0  ;;  %v1073_v42 = vmul.f32 %v2338_v16, %v1038_v33  ;;  %v1242_v27 = vld [vmem:[%s2537_s2 + $0x28] sm:$0xff] }
 0x4eb   :  { %vm1063_vm8 = vcmp.gt.f32.partialorder %v1033_v38, 0.0  ;;  %v1072_v43 = vmul.f32 %v2338_v16, %v1033_v38  ;;  %v1853_v44 = vpop.f32.mrb[16].mxu1  ;;  %v1115_v45 = vsub.f32 %v1107_v32, %v1111_v37  ;;  %v1239_v32 = vld [vmem:[%s2537_s2 + $0x10] sm:$0xff]  ;;  %2019 = vmatprep.subr.bf16.mxu1 %v2018_v31 }
 0x4ec   :  { %v1081_v46 = vsel %vm1064_vm7, %v1038_v33, %v1073_v42  ;;  %v1048_v47 = vadd.f32 %v1853_v44, %v1593_v12  ;;  %v1042_v48 = vpop.f32.mrb[17].mxu1  ;;  %2008 = vmatpush3.bf16.msra.mxu0 %v2007_v41  ;;  %v1114_v49 = vsub.f32 %v1106_v35, %v1110_v40  ;;  %v1244_v33 = vld [vmem:[%s2537_s2 + $0x38] sm:$0xff]  ;;  %v2020_v34 = vpack.c.bf16 %v1239_v32, %v1237_v30  ;;  %v1243_v37 = vld [vmem:[%s2537_s2 + $0x30] sm:$0xff]  ;;  %v50_v40 = vld [vmem:[%s2536_s1 + $0x60] sm:$0xff] }
 0x4ed   :  { %v1113_v51 = vmul.f32 %v1081_v46, %v1081_v46  ;;  %v1080_v52 = vsel %vm1063_vm8, %v1033_v38, %v1072_v43  ;;  %v1043_v53 = vadd.f32 %v1593_v12, %v1042_v48  ;;  %2009 = vmatprep.subr.bf16.mxu0 %v2110_v54  ;;  %v2022_v35 = vpack.c.bf16 %v1244_v33, %v1242_v27  ;;  %v48_v38 = vld [vmem:[%s2536_s1 + $0x50] sm:$0xff]  ;;  %v51_v42 = vld [vmem:[%s2536_s1 + $0x68] sm:$0xff] }
 0x4ee   :  { %v1112_v56 = vmul.f32 %v1080_v52, %v1080_v52  ;;  %v2010_v57 = vpack.c.bf16 %v1081_v46, %v1080_v52  ;;  %vm1066_vm9 = vcmp.gt.f32.partialorder %v1048_v47, 0.0  ;;  %v1075_v58 = vmul.f32 %v2338_v16, %v1048_v47  ;;  %2021 = vmatpush1.bf16.msra.mxu1 %v2020_v34  ;;  %v52_v44 = vld [vmem:[%s2536_s1 + $0x70] sm:$0xff]  ;;  %v55_v48 = vld [vmem:[%s2536_s1 + $0x88] sm:$0xff] }
 0x4ef   :  { %vm1065_vm11 = vcmp.gt.f32.partialorder %v1043_v53, 0.0  ;;  %v1074_v59 = vmul.f32 %v2338_v16, %v1043_v53  ;;  %v1856_v60 = vpop.f32.mrb[18].mxu1  ;;  %v1117_v61 = vsub.f32 %v1109_v50, %v1113_v51  ;;  %v2024_v28 = vpack.c.bf16 %v1243_v37, %v1241_v36  ;;  %2023 = vmatprep.subr.bf16.mxu1 %v2022_v35  ;;  %v56_v50 = vld [vmem:[%s2536_s1 + $0x90] sm:$0xff]  ;;  %v57_v51 = vld [vmem:[%s2536_s1 + $0x98] sm:$0xff]  ;;  %v1608_v30 = vld [vmem:[%s2536_s1 + $0x16c] ss:$0 sm:$0xff] }
 0x4f0   :  { %v1083_v63 = vsel %vm1066_vm9, %v1048_v47, %v1075_v58  ;;  %v1058_v1 = vadd.f32 %v1856_v60, %v1593_v12  ;;  %v1052_v2 = vpop.f32.mrb[19].mxu1  ;;  %2011 = vmatpush3.bf16.msra.mxu0 %v2010_v57  ;;  %v1116_v3 = vsub.f32 %v1108_v55, %v1112_v56  ;;  %v2027_v41 = vpack.c.bf16 %v49_v39, %v48_v38  ;;  %v54_v47 = vld [vmem:[%s2536_s1 + $0x80] sm:$0xff]  ;;  %v65_v38 = vld [vmem:[%s2536_s1 + $0xd8] sm:$0xff] }
 0x4f1   :  { %v1082_v62 = vsel %vm1065_vm11, %v1043_v53, %v1074_v59  ;;  %v1053_v0 = vadd.f32 %v1593_v12, %v1052_v2  ;;  %2012 = vmatprep.subr.bf16.mxu0 %v2110_v54  ;;  %v1119_v4 = vmul.f32 %v1083_v63, %v1083_v63  ;;  %v2030_v43 = vpack.c.bf16 %v51_v42, %v50_v40  ;;  %v66_v39 = vld [vmem:[%s2536_s1 + $0xe0] sm:$0xff] }
 0x4f2   :  { %v2013_v6 = vpack.c.bf16 %v1083_v63, %v1082_v62  ;;  %vm1068_vm12 = vcmp.gt.f32.partialorder %v1058_v1, 0.0  ;;  %v1077_v13 = vmul.f32 %v2338_v16, %v1058_v1  ;;  %v1118_v5 = vmul.f32 %v1082_v62, %v1082_v62  ;;  %2025 = vmatpush1.bf16.msra.mxu1 %v2024_v28  ;;  %v64_v28 = vld [vmem:[%s2536_s1 + $0xd0] sm:$0xff] }
 0x4f3   :  { %vm1067_vm13 = vcmp.gt.f32.partialorder %v1053_v0, 0.0  ;;  %v1076_v10 = vmul.f32 %v2338_v16, %v1053_v0  ;;  %v1123_v7 = vsub.f32 %v1115_v45, %v1119_v4  ;;  %v80_v16 = vld [vmem:[%s2536_s1 + $0x150] sm:$0xff]  ;;  %2050 = vmatprep.subr.bf16.mxu1 %v2110_v54  ;;  %v53_v45 = vld [vmem:[%s2536_s1 + $0x78] sm:$0xff]  ;;  %v2039_v52 = vpack.c.bf16 %v57_v51, %v56_v50 }
 0x4f4   :  { %v1085_v8 = vsel %vm1068_vm12, %v1058_v1, %v1077_v13  ;;  %2014 = vmatpush3.bf16.msra.mxu0 %v2013_v6  ;;  %v1122_v9 = vsub.f32 %v1114_v49, %v1118_v5  ;;  %v2033_v46 = vpack.c.bf16 %v53_v45, %v52_v44  ;;  %v2036_v49 = vpack.c.bf16 %v55_v48, %v54_v47  ;;  %v69_v44 = vld [vmem:[%s2536_s1 + $0xf8] sm:$0xff]  ;;  %v71_v47 = vld [vmem:[%s2536_s1 + $0x108] sm:$0xff] }
 0x4f5   :  { %v1084_v11 = vsel %vm1067_vm13, %v1053_v0, %v1076_v10  ;;  %v1129_v14 = vsel %vm822_vm2, %v1123_v7, 0.0  ;;  %2015 = vmatprep.subr.bf16.mxu0 %v2110_v54  ;;  %v1121_v12 = vmul.f32 %v1085_v8, %v1085_v8  ;;  %v1339_v32 = vstv %s1535_s17  ;;  %v73_v50 = vld [vmem:[%s2536_s1 + $0x118] sm:$0xff] }
 0x4f6   :  { %v2016_v15 = vpack.c.bf16 %v1085_v8, %v1084_v11  ;;  %1130 = vadd.xlane.f32.xlu1 %v1129_v14  ;;  %v1126_v17 = vsel %vm822_vm2, %v1122_v9, 0.0  ;;  %v1120_v18 = vmul.f32 %v1084_v11, %v1084_v11  ;;  %v58_v8 = vld [vmem:[%s2536_s1 + $0xa0] sm:$0xff]  ;;  %v59_v9 = vld [vmem:[%s2536_s1 + $0xa8] sm:$0xff]  ;;  %v60_v14 = vld [vmem:[%s2536_s1 + $0xb0] sm:$0xff]  ;;  %v2051_v40 = vpack.c.bf16 %v65_v38, %v64_v28 }
 0x4f7   :  { %1127 = vadd.xlane.f32.xlu0 %v1126_v17  ;;  %v1125_v19 = vsub.f32 %v1117_v61, %v1121_v12  ;;  %v2042_v11 = vpack.c.bf16 %v59_v9, %v58_v8  ;;  %v63_v17 = vld [vmem:[%s2536_s1 + $0xc8] sm:$0xff] }
 0x4f8   :  { %2017 = vmatpush3.bf16.msra.mxu0 %v2016_v15  ;;  %v1124_v21 = vsub.f32 %v1116_v3, %v1120_v18  ;;  %v62_v15 = vld [vmem:[%s2536_s1 + $0xc0] sm:$0xff]  ;;  %v1610_v8 = vld [vmem:[%s2536_s1 + $0x16e] ss:$0 sm:$0xff] }
 0x4f9   :  { %2026 = vmatprep.subr.bf16.mxu0 %v2110_v54  ;;  %v1135_v24 = vsel %vm822_vm2, %v1125_v19, 0.0  ;;  %v2048_v18 = vpack.c.bf16 %v63_v17, %v62_v15 }
 0x4fa   :  { %v1132_v22 = vsel %vm822_vm2, %v1124_v21, 0.0 }
 0x4fb   :  { %1874 = vmatmul.mubr.msk.f32.vlgmr.msra.gmra.mrb[28].mxu0 %vm418_vm10, %v80_v16  ;;  %1133 = vadd.xlane.f32.xlu0 %v1132_v22 }
 0x4fc   :  { %1876 = vmatprep.mubr.msk.f32.mxu0 %vm2111_vm5, %v2108_v20  ;;  %2028 = vmatpush3.bf16.msra.mxu0 %v2027_v41  ;;  %v67_v41 = vld [vmem:[%s2536_s1 + $0xe8] sm:$0xff] }
 0x4fd   :  { %2029 = vmatprep.subr.bf16.mxu0 %v2110_v54  ;;  %v2054_v42 = vpack.c.bf16 %v67_v41, %v66_v39 }
 0x4ff   :  { %1877 = vmatmul.mubr.msk.f32.gmra.mrb[30].mxu0 %vm418_vm10, %v81_v23  ;;  %1136 = vadd.xlane.f32.xlu0 %v1135_v24 }
 0x500   :  { %1879 = vmatprep.mubr.msk.f32.mxu0 %vm2111_vm5, %v2108_v20  ;;  %2031 = vmatpush3.bf16.msra.mxu0 %v2030_v43  ;;  %v68_v43 = vld [vmem:[%s2536_s1 + $0xf0] sm:$0xff] }
 0x501   :  { %2032 = vmatprep.subr.bf16.mxu0 %v2110_v54  ;;  %v2057_v45 = vpack.c.bf16 %v69_v44, %v68_v43 }
 0x503   :  { %1880 = vmatmul.mubr.msk.f32.gmra.mrb[32].mxu0 %vm418_vm10, %v82_v25  ;;  %vm1525_vm10 = vcmask 0  }
 0x504   :  { %1914 = vmatprep.mubr.msk.f32.mxu0 %vm2111_vm5, %v2108_v20  ;;  %2034 = vmatpush3.bf16.msra.mxu0 %v2033_v46  ;;  %v70_v46 = vld [vmem:[%s2536_s1 + $0x100] sm:$0xff] }
 0x505   :  { %2035 = vmatprep.subr.bf16.mxu0 %v2110_v54  ;;  %v2060_v48 = vpack.c.bf16 %v71_v47, %v70_v46 }
 0x508   :  { %2037 = vmatpush3.bf16.msra.mxu0 %v2036_v49  ;;  %v72_v49 = vld [vmem:[%s2536_s1 + $0x110] sm:$0xff] }
 0x509   :  { %2038 = vmatprep.subr.bf16.mxu0 %v2110_v54  ;;  %v2063_v51 = vpack.c.bf16 %v73_v50, %v72_v49 }
 0x50c   :  { %2040 = vmatpush3.bf16.msra.mxu0 %v2039_v52  ;;  %v74_v52 = vld [vmem:[%s2536_s1 + $0x120] sm:$0xff] }
 0x50d   :  { %2041 = vmatprep.subr.bf16.mxu0 %v2110_v54 }
 0x510   :  { %2043 = vmatpush3.bf16.msra.mxu0 %v2042_v11  ;;  %v1495_v11 = vstv %s1537_s27 }
 0x511   :  { %2044 = vmatprep.subr.bf16.mxu0 %v2110_v54 }
 0x583   :  { %v1131_v55 = vpop.xlane.xlu1 %1130 }
 0x584   :  { %v1128_v53 = vpop.xlane.xlu0 %1127 }
 0x585   :  { %v1138_v57 = vadd.f32 %v1131_v55, %v1128_v53  ;;  %v75_v53 = vld [vmem:[%s2536_s1 + $0x128] sm:$0xff] }
 0x586   :  { %v2066_v55 = vpack.c.bf16 %v75_v53, %v74_v52 }
 0x588   :  { %v1134_v56 = vpop.xlane.xlu0 %1133 }
 0x589   :  { %v1139_v58 = vadd.f32 %v1138_v57, %v1134_v56  ;;  %v76_v56 = vld [vmem:[%s2536_s1 + $0x130] sm:$0xff]  ;;  %v77_v57 = vld [vmem:[%s2536_s1 + $0x138] sm:$0xff] }
 0x58c   :  { %v1137_v59 = vpop.xlane.xlu0 %1136 }
 0x58d   :  { %v1140_v60 = vadd.f32 %v1139_v58, %v1137_v59  ;;  %v2069_v58 = vpack.c.bf16 %v77_v57, %v76_v56  ;;  %v78_v59 = vld [vmem:[%s2536_s1 + $0x140] sm:$0xff] }
 0x58f   :  { %v1141_v61 = vrot.slane %v1140_v60, 4 }
 0x591   :  { %v1142_v63 = vadd.f32 %v1141_v61, %v1140_v60  ;;  %v79_v60 = vld [vmem:[%s2536_s1 + $0x148] sm:$0xff] }
 0x592   :  { %v2072_v61 = vpack.c.bf16 %v79_v60, %v78_v59 }
 0x593   :  { %v1143_v1 = vrot.slane %v1142_v63, 2 }
 0x595   :  { %v1144_v2 = vadd.f32 %v1143_v1, %v1142_v63 }
 0x597   :  { %v1145_v3 = vrot.slane %v1144_v2, 1 }
 0x599   :  { %v1146_v62 = vadd.f32 %v1145_v3, %v1144_v2  ;;  %v1517_v2 = vstv %s1538_s22 }
 0x59b   :  { %v1147_v0 = vmul.f32 -3.0517578e-05, %v1146_v62 }
 0x59d   :  { %1526 = vst.msk [vmem:[%s2539_s4 + $0xc] sm:$0x1] %vm1525_vm10, %v1147_v0 }
 0x5ce   :  { %v1223_v4 = vpop.f32.mrb[28].mxu0 }
 0x5cf   :  { %v1875_v6 = vpop.f32.mrb[29].mxu0  ;;  %1605 = vmatmul.mubr.msk.f32.vlgmr.msra.gmra.mrb[20].mxu1 %vm822_vm2, %v1223_v4  ;;  %v1503_v16 = vrot.slane %v1223_v4, 2  ;;  %v1505_v21 = vrot.slane %v1223_v4, 7 }
 0x5d0   :  { %1322 = vmatprep.mubr.f32.mxu1 %v2108_v20  ;;  %2052 = vmatpush3.bf16.msra.mxu1 %v2051_v40  ;;  %v1417_v6 = vstv %s1536_s24 }
 0x5d1   :  { %v1507_v25 = vsel %vm594_vm3, %v1503_v16, %v1505_v21  ;;  %2053 = vmatprep.subr.bf16.mxu1 %v2110_v54  ;;  %vm1515_vm3 = vcmask 1043456  }
 0x5d2   :  { %v1228_v13 = vpop.f32.mrb[30].mxu0 }
 0x5d3   :  { %v1878_v5 = vpop.f32.mrb[31].mxu0  ;;  %1606 = vmatmul.mubr.msk.f32.gmra.mrb[22].mxu1 %vm822_vm2, %v1228_v13 }
 0x5d4   :  { %1327 = vmatprep.mubr.f32.mxu1 %v2108_v20  ;;  %2055 = vmatpush3.bf16.msra.mxu1 %v2054_v42 }
 0x5d5   :  { %2056 = vmatprep.subr.bf16.mxu1 %v2110_v54 }
 0x5d6   :  { %v1233_v10 = vpop.f32.mrb[32].mxu0 }
 0x5d7   :  { %v1881_v7 = vpop.f32.mrb[33].mxu0  ;;  %1607 = vmatmul.mubr.msk.f32.gmra.mrb[24].mxu1 %vm822_vm2, %v1233_v10 }
 0x5d8   :  { %1949 = vmatprep.mubr.msk.f32.mxu1 %vm2111_vm5, %v2108_v20  ;;  %v61_v20 = vld [vmem:[%s2536_s1 + $0xb8] sm:$0xff]  ;;  %2058 = vmatpush3.bf16.msra.mxu1 %v2057_v45  ;;  %vm1521_vm5 = vcmask 125952  }
 0x5d9   :  { %v2045_v12 = vpack.c.bf16 %v61_v20, %v60_v14  ;;  %2059 = vmatprep.subr.bf16.mxu1 %v2110_v54 }
 0x5db   :  { %2046 = vmatpush3.bf16.msra.mxu0 %v2045_v12 }
 0x5dc   :  { %2047 = vmatprep.subr.bf16.mxu0 %v2110_v54  ;;  %2061 = vmatpush3.bf16.msra.mxu1 %v2060_v48 }
 0x5dd   :  { %2062 = vmatprep.subr.bf16.mxu1 %v2110_v54 }
 0x5df   :  { %2049 = vmatpush3.bf16.msra.mxu0 %v2048_v18 }
 0x5e0   :  { %2064 = vmatpush3.bf16.msra.mxu1 %v2063_v51 }
 0x5e1   :  { %2065 = vmatprep.subr.bf16.mxu1 %v2110_v54 }
 0x5e4   :  { %2067 = vmatpush3.bf16.msra.mxu1 %v2066_v55 }
 0x5e5   :  { %2068 = vmatprep.subr.bf16.mxu1 %v2110_v54 }
 0x5e8   :  { %2070 = vmatpush3.bf16.msra.mxu1 %v2069_v58 }
 0x5e9   :  { %2071 = vmatprep.subr.bf16.mxu1 %v2110_v54  ;;  %v1609_v54 = vld [vmem:[%s2536_s1 + $0x16d] ss:$0 sm:$0xff] }
 0x5ec   :  { %2073 = vmatpush3.bf16.msra.mxu1 %v2072_v61 }
 0x6a2   :  { %v1320_v19 = vpop.f32.mrb[20].mxu1 }
 0x6a3   :  { %v1321_v22 = vpop.f32.mrb[21].mxu1 }
 0x6a6   :  { %v1324_v23 = vpop.f32.mrb[22].mxu1 }
 0x6a7   :  { %v1325_v24 = vpop.f32.mrb[23].mxu1 }
 0x6a8   :  { %v1498_v26 = vmul.f32 %v1325_v24, %v1223_v4  ;;  %v1508_v29 = vmul.f32 %v1507_v25, %v1325_v24 }
 0x6aa   :  { %v1329_v31 = vpop.f32.mrb[24].mxu1  ;;  %v1509_v27 = vsel %vm1499_vm14, %v1508_v29, 0.0  ;;  %v1500_v33 = vsel %vm1499_vm14, %v1498_v26, 0.0 }
 0x6ab   :  { %v1337_v34 = vadd.f32 %v1608_v30, %v1329_v31  ;;  %1510 = vadd.xlane.f32.xlu1 %v1509_v27  ;;  %v1331_v35 = vpop.f32.mrb[25].mxu1  ;;  %1501 = vadd.xlane.f32.xlu0 %v1500_v33 }
 0x6ad   :  { %vm1338_vm15 = vcmp.gt.f32.partialorder %v1337_v34, 0.0  ;;  %v1340_v36 = vmul.f32 %v1339_v32, %v1337_v34 }
 0x6af   :  { %v1341_v37 = vsel %vm1338_vm15, %v1337_v34, %v1340_v36 }
 0x6b0   :  { %1915 = vmatmul.mubr.f32.vlgmr.msra.gmra.mrb[34].mxu0 %v1341_v37 }
 0x738   :  { %v1511_v63 = vpop.xlane.xlu1 %1510  ;;  %v1502_v3 = vpop.xlane.xlu0 %1501 }
 0x739   :  { %v1513_v1 = vrot.slane %v1511_v63, 4 }
 0x73b   :  { %v1516_v62 = vsel %vm1515_vm3, %v1502_v3, %v1513_v1 }
 0x73c   :  { %v1518_v0 = vadd.f32 %v1517_v2, %v1516_v62 }
 0x73e   :  { %1524 = vst.msk [vmem:[%s2539_s4 + $0x4] sm:$0xff] %vm1523_vm1, %v1518_v0 }
 0x783   :  { %v1412_v4 = vpop.f32.mrb[34].mxu0 }
 0x784   :  { %v1413_v13 = vadd.f32 %v1609_v54, %v1412_v4  ;;  %v1916_v5 = vpop.f32.mrb[35].mxu0 }
 0x786   :  { %vm1416_vm2 = vcmp.gt.f32.partialorder %v1413_v13, 0.0  ;;  %v1418_v10 = vmul.f32 %v1417_v6, %v1413_v13 }
 0x788   :  { %v1419_v7 = vsel %vm1416_vm2, %v1413_v13, %v1418_v10 }
 0x789   :  { %1950 = vmatmul.mubr.f32.vlgmr.msra.gmra.mrb[26].mxu1 %v1419_v7 }
 0x85c   :  { %v1490_v9 = vpop.f32.mrb[26].mxu1 }
 0x85d   :  { %v1491_v14 = vadd.f32 %v1610_v8, %v1490_v9  ;;  %v1951_v20 = vpop.f32.mrb[27].mxu1 }
 0x85f   :  { %vm1494_vm4 = vcmp.gt.f32.partialorder %v1491_v14, 0.0  ;;  %v1496_v12 = vmul.f32 %v1495_v11, %v1491_v14 }
 0x861   :  { %v1497_v15 = vsel %vm1494_vm4, %v1491_v14, %v1496_v12 }
 0x862   :  { %1522 = vst.msk [vmem:[%s2539_s4] sm:$0xf] %vm1521_vm5, %v1497_v15 }
 0x863   :  { %1531 = vsyncpa [#allocation3], 1 }

</bundles_post_ra>
